<compile_context>
chip_gen: v7x
topology: tpu7x:2x2x1
jax: 0.10.0
libtpu: 0.0.40
codegen_flags: <defaults>
</compile_context>

<pallas_src>
import functools

import jax
import jax.numpy as jnp
from jax.experimental import pallas as pl
from jax.experimental.pallas import tpu as pltpu

F32 = jnp.float32
BF16 = jnp.bfloat16
BN_EPS = 1e-5
LANE = 128          # TPU lane width; small outputs / weights are padded to this


def _vmem_spec():
    return pl.BlockSpec(memory_space=pltpu.MemorySpace.VMEM)


# --------------------------------- kernel -----------------------------------

def fused_forward_kernel(
    # graph + features
    h0_ref, e0_ref, inc_ref, dstt_ref,
    # stacked per-layer GatedGCN params
    lw_ref, lv_ref,
    # packed misc params (embeddings, bi-layer, readout MLP)
    misc_ref,
    # outputs (lane-padded)
    logits_ref, s_ref,
    *, n_layers, bi_layer_idx, hidden_dim, assign_dim, inv_sigma, residual,
    misc_off):
    H = hidden_dim
    E = inc_ref.shape[0] // 2          # inc = concat([src_oh, dst_oh], axis=0)

    def take(name):
        r, h, w = misc_off[name]       # static offsets -> static ref slices
        return misc_ref[r:r + h, 0:w]

    # bf16 0/1 incidence operands (exact, half the VMEM of f32); kept bf16 so
    # every gather/scatter matmul runs at native MXU bf16 rate with f32 acc.
    inc = inc_ref[...]                 # (2E, N) bf16
    dst_t = dstt_ref[...]              # (N, E) bf16 (transposed host-side)

    # ---- input embeddings ---------------------------------------------------
    h = jnp.dot(h0_ref[...], take("emb_h_w"),
                preferred_element_type=F32) + take("emb_h_b")        # (N, H)
    e = jnp.dot(e0_ref[...], take("emb_e_w"),
                preferred_element_type=F32) + take("emb_e_b")        # (E, H)

    # ---- GatedGCN layers (statically unrolled) ------------------------------
    for li in range(n_layers):
        wl = lw_ref[li]                       # (2H, 4H): rows 0:H = A|B|D|E, rows H:2H = C
        lv = lv_ref[li]                       # (8, 4H): bh | bc | folded BN
        wh = wl[0:H, :]                       # (H, 4H)
        wc = wl[H:2 * H, 0:H]                 # (H, H)
        bh = lv[0:1, :]                       # (1, 4H)
        bc = lv[1:2, 0:H]                     # (1, H)
        bn = lv[2:6, 0:H]                     # (4, H): h_scale,h_shift,e_scale,e_shift

        # Fused A|B|D|E projection: (N, H) @ (H, 4H) -> lane-dense (N, 128).
        abde = jnp.dot(h, wh, preferred_element_type=F32) + bh       # (N, 4H)
        ce = jnp.dot(e, wc, preferred_element_type=F32) + bc         # (E, H)

        # One fused gather (shared RHS): [src; dst] one-hot @ ABDE (bf16 x bf16).
        gath = jnp.dot(inc, abde.astype(BF16),
                       preferred_element_type=F32)                   # (2E, 4H)
        src_g = gath[0:E]                 # gathered at edge sources
        dst_g = gath[E:2 * E]             # gathered at edge destinations

        ah = abde[:, 0:H]                 # A(h_i) at nodes
        bh_src = src_g[:, H:2 * H]        # B(h_j) at edge sources
        dh_src = src_g[:, 2 * H:3 * H]    # D(h_j) at edge sources
        eh_dst = dst_g[:, 3 * H:4 * H]    # E(h_i) at edge destinations

        e_new = ce + dh_src + eh_dst                                  # (E, H)
        sig = jax.nn.sigmoid(e_new)

        # One fused scatter-add (shared (N,E) LHS): dst^T @ [sig*Bh | sig].
        rhs = jnp.concatenate([sig * bh_src, sig], axis=-1).astype(BF16)  # (E, 2H)
        agg = jnp.dot(dst_t, rhs, preferred_element_type=F32)             # (N, 2H)
        num = agg[:, 0:H]
        den = agg[:, H:2 * H]
        h_new = ah + num * pl.reciprocal(den + 1e-6, approx=True)

        # Folded eval-mode BatchNorm (pure affine) + ReLU.
        h_new = jnp.maximum(h_new * bn[0:1, :] + bn[1:2, :], 0.0)
        e_new = jnp.maximum(e_new * bn[2:3, :] + bn[3:4, :], 0.0)
        if residual:
            h_new = h + h_new
            e_new = e + e_new
        # dropout: eval-mode semantics -> identity
        h, e = h_new, e_new

        if li == bi_layer_idx:
            # TODO(synk): biGatedGCNLayer source was not provided; the soft
            # assignment branch is implemented as softmax((h @ Ws + bs) / sigma).
            logits = (jnp.dot(h, take("ws"), preferred_element_type=F32)
                      + take("bs")) * inv_sigma                       # (N, 128)
            lane = jax.lax.broadcasted_iota(jnp.int32, logits.shape, 1)
            logits = jnp.where(lane < assign_dim, logits, -1e30)
            m = jnp.max(logits, axis=-1, keepdims=True)
            ex = jnp.exp(logits - m)
            s_ref[...] = ex * pl.reciprocal(
                jnp.sum(ex, axis=-1, keepdims=True), approx=True)

    # ---- edge readout: MLP(cat[h_src, h_dst]) -------------------------------
    hcat = jnp.dot(inc, h.astype(BF16), preferred_element_type=F32)   # (2E, H)
    e_cat = jnp.concatenate([hcat[0:E], hcat[E:2 * E]], axis=-1)      # (E, 2H)
    y = jnp.maximum(jnp.dot(e_cat, take("w1"), preferred_element_type=F32)
                    + take("b1"), 0.0)
    y = jnp.maximum(jnp.dot(y, take("w2"), preferred_element_type=F32)
                    + take("b2"), 0.0)
    logits_ref[...] = (jnp.dot(y, take("w3"), preferred_element_type=F32)
                       + take("b3"))


# ------------------------------ pallas wrapper -------------------------------

def bi_gated_gcn_net_forward(params, misc_off, h0, e0, src_idx, dst_idx, *,
                             sigma, assign_dim, n_classes, bi_layer_idx=1,
                             residual=True):
    N = h0.shape[0]
    E = src_idx.shape[0]
    L = params["layer_w"].shape[0]
    H = params["layer_w"].shape[1] // 2
    H4 = 4 * H

    # bf16 one-hot incidence (exact 0/1 -> lossless; half the HBM/DMA bytes).
    # Fused [src; dst] gather matrix + host-side transposed dst for the scatter
    # (no in-kernel f32 copy / XLU transpose).
    src_oh = jax.nn.one_hot(src_idx, N, dtype=BF16)       # (E, N)
    dst_oh = jax.nn.one_hot(dst_idx, N, dtype=BF16)       # (E, N)
    inc = jnp.concatenate([src_oh, dst_oh], axis=0)       # (2E, N)
    dst_t = dst_oh.T                                      # (N, E)

    kernel = functools.partial(
        fused_forward_kernel,
        n_layers=L, bi_layer_idx=bi_layer_idx, hidden_dim=H,
        assign_dim=assign_dim, inv_sigma=float(1.0 / sigma),
        residual=residual, misc_off=misc_off)

    # Advisory cost estimate for XLA scheduling around the custom call.
    flops_layer = (2 * N * H * H4            # fused A|B|D|E projection
                   + 2 * E * H * H           # C projection
                   + 2 * (2 * E) * N * H4    # fused src/dst gather
                   + 2 * N * E * (2 * H))    # fused scatter-add
    flops = int(L * flops_layer
                + 2 * N * h0.shape[1] * H + 2 * E * e0.shape[1] * H
                + 2 * N * H * LANE
                + 2 * (2 * E) * N * H
                + 2 * E * (2 * H * H + H * (H // 2) + (H // 2) * LANE))
    transcendentals = int(L * E * H + N * LANE)
    bytes_accessed = int(sum(int(a.size) * a.dtype.itemsize for a in
                             (h0, e0, inc, dst_t, params["layer_w"],
                              params["layer_v"], params["misc"]))
                         + (E + N) * LANE * 4)

    logits_pad, s_pad = pl.pallas_call(
        kernel,
        out_shape=(jax.ShapeDtypeStruct((E, LANE), F32),
                   jax.ShapeDtypeStruct((N, LANE), F32)),
        in_specs=[_vmem_spec()] * 7,
        out_specs=(_vmem_spec(), _vmem_spec()),
        compiler_params=pltpu.CompilerParams(
            # Above v5e's 16 MiB default scoped limit, below v7x's 64 MiB
            # physical VMEM.  TODO(synk): re-budget / tile over an edge grid
            # once graphs grow past toy size.
            vmem_limit_bytes=48 * 1024 * 1024),
        cost_estimate=pl.CostEstimate(flops=flops,
                                      transcendentals=transcendentals,
                                      bytes_accessed=bytes_accessed),
    )(h0, e0, inc, dst_t, params["layer_w"], params["layer_v"], params["misc"])
    # lane-dense kernel outputs, sliced back to the logical widths
    return logits_pad[:, :n_classes], s_pad[:, :assign_dim]


# ------------------------------ parameter init -------------------------------

def init_linear(key, fan_in, fan_out):
    kw, kb = jax.random.split(key)
    bound = 1.0 / (fan_in ** 0.5)
    w = jax.random.uniform(kw, (fan_in, fan_out), F32, -bound, bound)
    b = jax.random.uniform(kb, (1, fan_out), F32, -bound, bound)
    return w, b


def fold_batch_norm(gamma, beta, mean, var, eps=BN_EPS):
    scale = gamma / jnp.sqrt(var + eps)
    shift = beta - mean * scale
    return scale, shift


def pack_rows(entries, align=8):
    """Stack 2-D f32 arrays as 8-row-aligned blocks of one (R, LANE) slab."""
    offsets = {}
    blocks = []
    r = 0
    for name, a in entries:
        a = jnp.asarray(a, F32)
        h, w = a.shape
        assert w <= LANE
        hp = -(-h // align) * align
        block = jnp.zeros((hp, LANE), F32).at[:h, :w].set(a)
        blocks.append(block)
        offsets[name] = (r, h, w)
        r += hp
    return jnp.concatenate(blocks, axis=0), offsets


def init_gcn_layer(key, dim):
    keys = jax.random.split(key, 5)
    a_w, a_b = init_linear(keys[0], dim, dim)   # A
    b_w, b_b = init_linear(keys[1], dim, dim)   # B
    c_w, c_b = init_linear(keys[2], dim, dim)   # C
    d_w, d_b = init_linear(keys[3], dim, dim)   # D
    e_w, e_b = init_linear(keys[4], dim, dim)   # E
    wh = jnp.concatenate([a_w, b_w, d_w, e_w], axis=1)      # (H, 4H) lane-dense
    bh = jnp.concatenate([a_b, b_b, d_b, e_b], axis=1)      # (1, 4H)

    lw = jnp.zeros((2 * dim, 4 * dim), F32)
    lw = lw.at[:dim, :].set(wh)                             # rows 0:H  -> A|B|D|E
    lw = lw.at[dim:, :dim].set(c_w)                         # rows H:2H -> C

    ones = jnp.ones((dim,), F32)
    zeros = jnp.zeros((dim,), F32)
    h_scale, h_shift = fold_batch_norm(ones, zeros, zeros, ones)
    e_scale, e_shift = fold_batch_norm(ones, zeros, zeros, ones)
    lv = jnp.zeros((8, 4 * dim), F32)
    lv = lv.at[0, :].set(bh[0])
    lv = lv.at[1, :dim].set(c_b[0])
    lv = lv.at[2, :dim].set(h_scale)
    lv = lv.at[3, :dim].set(h_shift)
    lv = lv.at[4, :dim].set(e_scale)
    lv = lv.at[5, :dim].set(e_shift)
    return lw, lv


def init_params(key, in_dim, in_dim_edge, hidden_dim, out_dim, n_classes,
                assign_dim, n_layers):
    keys = jax.random.split(key, n_layers + 4)
    emb_h_w, emb_h_b = init_linear(keys[0], in_dim, hidden_dim)
    emb_e_w, emb_e_b = init_linear(keys[1], in_dim_edge, hidden_dim)

    lws, lvs = [], []
    for li in range(n_layers):
        lw, lv = init_gcn_layer(keys[2 + li], hidden_dim)
        lws.append(lw)
        lvs.append(lv)

    ws, bs = init_linear(keys[2 + n_layers], hidden_dim, assign_dim)
    ws_pad = jnp.zeros((hidden_dim, LANE), F32).at[:, :assign_dim].set(ws)
    bs_pad = jnp.zeros((1, LANE), F32).at[:, :assign_dim].set(bs)

    # MLP readout (L=2): 2*out_dim -> out_dim -> out_dim//2 -> n_classes
    mkeys = jax.random.split(keys[3 + n_layers], 3)
    dims = [2 * out_dim, out_dim, out_dim // 2, n_classes]
    w1, b1 = init_linear(mkeys[0], dims[0], dims[1])
    w2, b2 = init_linear(mkeys[1], dims[1], dims[2])
    w3, b3 = init_linear(mkeys[2], dims[2], dims[3])
    w3_pad = jnp.zeros((dims[2], LANE), F32).at[:, :n_classes].set(w3)
    b3_pad = jnp.zeros((1, LANE), F32).at[:, :n_classes].set(b3)

    misc, misc_off = pack_rows([
        ("emb_h_w", emb_h_w), ("emb_h_b", emb_h_b),
        ("emb_e_w", emb_e_w), ("emb_e_b", emb_e_b),
        ("ws", ws_pad), ("bs", bs_pad),
        ("w1", w1), ("b1", b1),
        ("w2", w2), ("b2", b2),
        ("w3", w3_pad), ("b3", b3_pad),
    ])

    params = {"layer_w": jnp.stack(lws),    # (L, 2H, 4H)
              "layer_v": jnp.stack(lvs),    # (L, 8, 4H)
              "misc": misc}                 # (R, 128)
    return params, misc_off


# ----------------------------------- main ------------------------------------

if __name__ == "__main__":
    key = jax.random.PRNGKey(0)
    N, E = 16, 48                  # nodes, directed edges
    in_dim, in_dim_edge = 2, 1     # TSP node coords / edge scalar feature
    hidden_dim = out_dim = 32
    n_classes = 2
    assign_dim = 8
    n_layers = 4                   # [GatedGCN, biGatedGCN, GatedGCN, GatedGCN]
    sigma = 0.5

    keys = jax.random.split(key, 8)
    src_idx = jax.random.randint(keys[0], (E,), 0, N)
    dst_idx = jax.random.randint(keys[1], (E,), 0, N)

    h0 = jax.random.normal(keys[2], (N, in_dim), F32)
    e0 = jax.random.normal(keys[3], (E, in_dim_edge), F32)

    params, misc_off = init_params(keys[4], in_dim, in_dim_edge, hidden_dim,
                                   out_dim, n_classes, assign_dim, n_layers)

    edge_logits, s = bi_gated_gcn_net_forward(
        params, misc_off, h0, e0, src_idx, dst_idx,
        sigma=sigma, assign_dim=assign_dim, n_classes=n_classes)
    jax.block_until_ready((edge_logits, s))
    assert edge_logits.shape == (E, n_classes)
    assert s.shape == (N, assign_dim)
    assert bool(jnp.all(jnp.isfinite(edge_logits)))
    assert bool(jnp.all(jnp.isfinite(s)))
    print("KERNEL_OK")
</pallas_src>

<mosaic_0001>
module attributes {stable_mosaic.version = 11 : i64} {
  func.func @fused_forward_kernel(%arg0: memref<16x2xf32, #tpu.memory_space<vmem>>, %arg1: memref<48x1xf32, #tpu.memory_space<vmem>>, %arg2: memref<96x16xbf16, #tpu.memory_space<vmem>>, %arg3: memref<16x48xbf16, #tpu.memory_space<vmem>>, %arg4: memref<4x64x128xf32, #tpu.memory_space<vmem>>, %arg5: memref<4x8x128xf32, #tpu.memory_space<vmem>>, %arg6: memref<208x128xf32, #tpu.memory_space<vmem>>, %arg7: memref<48x128xf32, #tpu.memory_space<vmem>>, %arg8: memref<16x128xf32, #tpu.memory_space<vmem>>) attributes {dimension_semantics = [], scalar_prefetch = 0 : i64, scratch_operands = 0 : i64, tpu.core_type = #tpu.core_type<tc>} {
    %c0 = arith.constant 0 : index
    %c0_0 = arith.constant 0 : index
    %0 = vector.load %arg2[%c0, %c0_0] : memref<96x16xbf16, #tpu.memory_space<vmem>>, vector<96x16xbf16>
    %c0_1 = arith.constant 0 : index
    %c0_2 = arith.constant 0 : index
    %1 = vector.load %arg3[%c0_1, %c0_2] : memref<16x48xbf16, #tpu.memory_space<vmem>>, vector<16x48xbf16>
    %c0_3 = arith.constant 0 : index
    %c0_4 = arith.constant 0 : index
    %2 = vector.load %arg0[%c0_3, %c0_4] : memref<16x2xf32, #tpu.memory_space<vmem>>, vector<16x2xf32>
    %c0_5 = arith.constant 0 : index
    %c0_6 = arith.constant 0 : index
    %3 = vector.load %arg6[%c0_5, %c0_6] : memref<208x128xf32, #tpu.memory_space<vmem>>, vector<2x32xf32>
    %cst = arith.constant dense<0.000000e+00> : vector<16x32xf32>
    %4 = tpu.matmul %2, %3, %cst {dimension_numbers = #tpu.dot_dimension_numbers<[1], [0], [0], [1], [0, 0, 1, 1], [], []>} : vector<16x2xf32>, vector<2x32xf32>, vector<16x32xf32> -> vector<16x32xf32>
    %c8 = arith.constant 8 : index
    %c0_7 = arith.constant 0 : index
    %5 = vector.load %arg6[%c8, %c0_7] : memref<208x128xf32, #tpu.memory_space<vmem>>, vector<1x32xf32>
    %6 = vector.broadcast %5 : vector<1x32xf32> to vector<16x32xf32>
    %7 = arith.addf %4, %6 : vector<16x32xf32>
    %c0_8 = arith.constant 0 : index
    %c0_9 = arith.constant 0 : index
    %8 = vector.load %arg1[%c0_8, %c0_9] : memref<48x1xf32, #tpu.memory_space<vmem>>, vector<48x1xf32>
    %c16 = arith.constant 16 : index
    %c0_10 = arith.constant 0 : index
    %9 = vector.load %arg6[%c16, %c0_10] : memref<208x128xf32, #tpu.memory_space<vmem>>, vector<1x32xf32>
    %cst_11 = arith.constant dense<0.000000e+00> : vector<48x32xf32>
    %10 = tpu.matmul %8, %9, %cst_11 {dimension_numbers = #tpu.dot_dimension_numbers<[1], [0], [0], [1], [0, 0, 1, 1], [], []>} : vector<48x1xf32>, vector<1x32xf32>, vector<48x32xf32> -> vector<48x32xf32>
    %c24 = arith.constant 24 : index
    %c0_12 = arith.constant 0 : index
    %11 = vector.load %arg6[%c24, %c0_12] : memref<208x128xf32, #tpu.memory_space<vmem>>, vector<1x32xf32>
    %12 = vector.broadcast %11 : vector<1x32xf32> to vector<48x32xf32>
    %13 = arith.addf %10, %12 : vector<48x32xf32>
    %c0_13 = arith.constant 0 : index
    %c0_14 = arith.constant 0 : index
    %c0_15 = arith.constant 0 : index
    %14 = vector.load %arg4[%c0_13, %c0_14, %c0_15] : memref<4x64x128xf32, #tpu.memory_space<vmem>>, vector<1x64x128xf32>
    %15 = vector.shape_cast %14 : vector<1x64x128xf32> to vector<64x128xf32>
    %c0_16 = arith.constant 0 : index
    %c0_17 = arith.constant 0 : index
    %c0_18 = arith.constant 0 : index
    %16 = vector.load %arg5[%c0_16, %c0_17, %c0_18] : memref<4x8x128xf32, #tpu.memory_space<vmem>>, vector<1x8x128xf32>
    %17 = vector.shape_cast %16 : vector<1x8x128xf32> to vector<8x128xf32>
    %18 = vector.extract_strided_slice %15 {offsets = [0, 0], sizes = [32, 128], strides = [1, 1]} : vector<64x128xf32> to vector<32x128xf32>
    %19 = vector.extract_strided_slice %15 {offsets = [32, 0], sizes = [32, 32], strides = [1, 1]} : vector<64x128xf32> to vector<32x32xf32>
    %20 = vector.extract_strided_slice %17 {offsets = [0, 0], sizes = [1, 128], strides = [1, 1]} : vector<8x128xf32> to vector<1x128xf32>
    %21 = vector.extract_strided_slice %17 {offsets = [1, 0], sizes = [1, 32], strides = [1, 1]} : vector<8x128xf32> to vector<1x32xf32>
    %22 = vector.extract_strided_slice %17 {offsets = [2, 0], sizes = [4, 32], strides = [1, 1]} : vector<8x128xf32> to vector<4x32xf32>
    %cst_19 = arith.constant dense<0.000000e+00> : vector<16x128xf32>
    %23 = tpu.matmul %7, %18, %cst_19 {dimension_numbers = #tpu.dot_dimension_numbers<[1], [0], [0], [1], [0, 0, 1, 1], [], []>} : vector<16x32xf32>, vector<32x128xf32>, vector<16x128xf32> -> vector<16x128xf32>
    %24 = vector.broadcast %20 : vector<1x128xf32> to vector<16x128xf32>
    %25 = arith.addf %23, %24 : vector<16x128xf32>
    %cst_20 = arith.constant dense<0.000000e+00> : vector<48x32xf32>
    %26 = tpu.matmul %13, %19, %cst_20 {dimension_numbers = #tpu.dot_dimension_numbers<[1], [0], [0], [1], [0, 0, 1, 1], [], []>} : vector<48x32xf32>, vector<32x32xf32>, vector<48x32xf32> -> vector<48x32xf32>
    %27 = vector.broadcast %21 : vector<1x32xf32> to vector<48x32xf32>
    %28 = arith.addf %26, %27 : vector<48x32xf32>
    %29 = arith.truncf %25 : vector<16x128xf32> to vector<16x128xbf16>
    %cst_21 = arith.constant dense<0.000000e+00> : vector<96x128xf32>
    %30 = tpu.matmul %0, %29, %cst_21 {dimension_numbers = #tpu.dot_dimension_numbers<[1], [0], [0], [1], [0, 0, 1, 1], [], []>} : vector<96x16xbf16>, vector<16x128xbf16>, vector<96x128xf32> -> vector<96x128xf32>
    %31 = vector.extract_strided_slice %30 {offsets = [0, 0], sizes = [48, 128], strides = [1, 1]} : vector<96x128xf32> to vector<48x128xf32>
    %32 = vector.extract_strided_slice %30 {offsets = [48, 0], sizes = [48, 128], strides = [1, 1]} : vector<96x128xf32> to vector<48x128xf32>
    %33 = vector.extract_strided_slice %25 {offsets = [0, 0], sizes = [16, 32], strides = [1, 1]} : vector<16x128xf32> to vector<16x32xf32>
    %34 = vector.extract_strided_slice %31 {offsets = [0, 32], sizes = [48, 32], strides = [1, 1]} : vector<48x128xf32> to vector<48x32xf32>
    %35 = vector.extract_strided_slice %31 {offsets = [0, 64], sizes = [48, 32], strides = [1, 1]} : vector<48x128xf32> to vector<48x32xf32>
    %36 = vector.extract_strided_slice %32 {offsets = [0, 96], sizes = [48, 32], strides = [1, 1]} : vector<48x128xf32> to vector<48x32xf32>
    %37 = arith.addf %28, %35 : vector<48x32xf32>
    %38 = arith.addf %37, %36 : vector<48x32xf32>
    %39 = arith.negf %38 : vector<48x32xf32>
    %40 = math.exp %39 : vector<48x32xf32>
    %cst_22 = arith.constant 1.000000e+00 : f32
    %41 = vector.broadcast %cst_22 : f32 to vector<48x32xf32>
    %42 = arith.addf %41, %40 : vector<48x32xf32>
    %43 = arith.divf %41, %42 : vector<48x32xf32>
    %44 = arith.mulf %43, %34 : vector<48x32xf32>
    %45 = tpu.concatenate %44, %43 in 1 : vector<48x32xf32>, vector<48x32xf32> -> vector<48x64xf32>
    %46 = arith.truncf %45 : vector<48x64xf32> to vector<48x64xbf16>
    %cst_23 = arith.constant dense<0.000000e+00> : vector<16x64xf32>
    %47 = tpu.matmul %1, %46, %cst_23 {dimension_numbers = #tpu.dot_dimension_numbers<[1], [0], [0], [1], [0, 0, 1, 1], [], []>} : vector<16x48xbf16>, vector<48x64xbf16>, vector<16x64xf32> -> vector<16x64xf32>
    %48 = vector.extract_strided_slice %47 {offsets = [0, 0], sizes = [16, 32], strides = [1, 1]} : vector<16x64xf32> to vector<16x32xf32>
    %49 = vector.extract_strided_slice %47 {offsets = [0, 32], sizes = [16, 32], strides = [1, 1]} : vector<16x64xf32> to vector<16x32xf32>
    %cst_24 = arith.constant 9.99999997E-7 : f32
    %50 = vector.broadcast %cst_24 : f32 to vector<16x32xf32>
    %51 = arith.addf %49, %50 : vector<16x32xf32>
    %52 = tpu.reciprocal %51 {approx = true} : vector<16x32xf32> -> vector<16x32xf32>
    %53 = arith.mulf %48, %52 : vector<16x32xf32>
    %54 = arith.addf %33, %53 : vector<16x32xf32>
    %55 = vector.extract_strided_slice %22 {offsets = [0, 0], sizes = [1, 32], strides = [1, 1]} : vector<4x32xf32> to vector<1x32xf32>
    %56 = vector.broadcast %55 : vector<1x32xf32> to vector<16x32xf32>
    %57 = arith.mulf %54, %56 : vector<16x32xf32>
    %58 = vector.extract_strided_slice %22 {offsets = [1, 0], sizes = [1, 32], strides = [1, 1]} : vector<4x32xf32> to vector<1x32xf32>
    %59 = vector.broadcast %58 : vector<1x32xf32> to vector<16x32xf32>
    %60 = arith.addf %57, %59 : vector<16x32xf32>
    %cst_25 = arith.constant 0.000000e+00 : f32
    %61 = vector.broadcast %cst_25 : f32 to vector<16x32xf32>
    %62 = arith.maximumf %60, %61 : vector<16x32xf32>
    %63 = vector.extract_strided_slice %22 {offsets = [2, 0], sizes = [1, 32], strides = [1, 1]} : vector<4x32xf32> to vector<1x32xf32>
    %64 = vector.broadcast %63 : vector<1x32xf32> to vector<48x32xf32>
    %65 = arith.mulf %38, %64 : vector<48x32xf32>
    %66 = vector.extract_strided_slice %22 {offsets = [3, 0], sizes = [1, 32], strides = [1, 1]} : vector<4x32xf32> to vector<1x32xf32>
    %67 = vector.broadcast %66 : vector<1x32xf32> to vector<48x32xf32>
    %68 = arith.addf %65, %67 : vector<48x32xf32>
    %cst_26 = arith.constant 0.000000e+00 : f32
    %69 = vector.broadcast %cst_26 : f32 to vector<48x32xf32>
    %70 = arith.maximumf %68, %69 : vector<48x32xf32>
    %71 = arith.addf %7, %62 : vector<16x32xf32>
    %72 = arith.addf %13, %70 : vector<48x32xf32>
    %c1 = arith.constant 1 : index
    %c0_27 = arith.constant 0 : index
    %c0_28 = arith.constant 0 : index
    %73 = vector.load %arg4[%c1, %c0_27, %c0_28] : memref<4x64x128xf32, #tpu.memory_space<vmem>>, vector<1x64x128xf32>
    %74 = vector.shape_cast %73 : vector<1x64x128xf32> to vector<64x128xf32>
    %c1_29 = arith.constant 1 : index
    %c0_30 = arith.constant 0 : index
    %c0_31 = arith.constant 0 : index
    %75 = vector.load %arg5[%c1_29, %c0_30, %c0_31] : memref<4x8x128xf32, #tpu.memory_space<vmem>>, vector<1x8x128xf32>
    %76 = vector.shape_cast %75 : vector<1x8x128xf32> to vector<8x128xf32>
    %77 = vector.extract_strided_slice %74 {offsets = [0, 0], sizes = [32, 128], strides = [1, 1]} : vector<64x128xf32> to vector<32x128xf32>
    %78 = vector.extract_strided_slice %74 {offsets = [32, 0], sizes = [32, 32], strides = [1, 1]} : vector<64x128xf32> to vector<32x32xf32>
    %79 = vector.extract_strided_slice %76 {offsets = [0, 0], sizes = [1, 128], strides = [1, 1]} : vector<8x128xf32> to vector<1x128xf32>
    %80 = vector.extract_strided_slice %76 {offsets = [1, 0], sizes = [1, 32], strides = [1, 1]} : vector<8x128xf32> to vector<1x32xf32>
    %81 = vector.extract_strided_slice %76 {offsets = [2, 0], sizes = [4, 32], strides = [1, 1]} : vector<8x128xf32> to vector<4x32xf32>
    %cst_32 = arith.constant dense<0.000000e+00> : vector<16x128xf32>
    %82 = tpu.matmul %71, %77, %cst_32 {dimension_numbers = #tpu.dot_dimension_numbers<[1], [0], [0], [1], [0, 0, 1, 1], [], []>} : vector<16x32xf32>, vector<32x128xf32>, vector<16x128xf32> -> vector<16x128xf32>
    %83 = vector.broadcast %79 : vector<1x128xf32> to vector<16x128xf32>
    %84 = arith.addf %82, %83 : vector<16x128xf32>
    %cst_33 = arith.constant dense<0.000000e+00> : vector<48x32xf32>
    %85 = tpu.matmul %72, %78, %cst_33 {dimension_numbers = #tpu.dot_dimension_numbers<[1], [0], [0], [1], [0, 0, 1, 1], [], []>} : vector<48x32xf32>, vector<32x32xf32>, vector<48x32xf32> -> vector<48x32xf32>
    %86 = vector.broadcast %80 : vector<1x32xf32> to vector<48x32xf32>
    %87 = arith.addf %85, %86 : vector<48x32xf32>
    %88 = arith.truncf %84 : vector<16x128xf32> to vector<16x128xbf16>
    %cst_34 = arith.constant dense<0.000000e+00> : vector<96x128xf32>
    %89 = tpu.matmul %0, %88, %cst_34 {dimension_numbers = #tpu.dot_dimension_numbers<[1], [0], [0], [1], [0, 0, 1, 1], [], []>} : vector<96x16xbf16>, vector<16x128xbf16>, vector<96x128xf32> -> vector<96x128xf32>
    %90 = vector.extract_strided_slice %89 {offsets = [0, 0], sizes = [48, 128], strides = [1, 1]} : vector<96x128xf32> to vector<48x128xf32>
    %91 = vector.extract_strided_slice %89 {offsets = [48, 0], sizes = [48, 128], strides = [1, 1]} : vector<96x128xf32> to vector<48x128xf32>
    %92 = vector.extract_strided_slice %84 {offsets = [0, 0], sizes = [16, 32], strides = [1, 1]} : vector<16x128xf32> to vector<16x32xf32>
    %93 = vector.extract_strided_slice %90 {offsets = [0, 32], sizes = [48, 32], strides = [1, 1]} : vector<48x128xf32> to vector<48x32xf32>
    %94 = vector.extract_strided_slice %90 {offsets = [0, 64], sizes = [48, 32], strides = [1, 1]} : vector<48x128xf32> to vector<48x32xf32>
    %95 = vector.extract_strided_slice %91 {offsets = [0, 96], sizes = [48, 32], strides = [1, 1]} : vector<48x128xf32> to vector<48x32xf32>
    %96 = arith.addf %87, %94 : vector<48x32xf32>
    %97 = arith.addf %96, %95 : vector<48x32xf32>
    %98 = arith.negf %97 : vector<48x32xf32>
    %99 = math.exp %98 : vector<48x32xf32>
    %cst_35 = arith.constant 1.000000e+00 : f32
    %100 = vector.broadcast %cst_35 : f32 to vector<48x32xf32>
    %101 = arith.addf %100, %99 : vector<48x32xf32>
    %102 = arith.divf %100, %101 : vector<48x32xf32>
    %103 = arith.mulf %102, %93 : vector<48x32xf32>
    %104 = tpu.concatenate %103, %102 in 1 : vector<48x32xf32>, vector<48x32xf32> -> vector<48x64xf32>
    %105 = arith.truncf %104 : vector<48x64xf32> to vector<48x64xbf16>
    %cst_36 = arith.constant dense<0.000000e+00> : vector<16x64xf32>
    %106 = tpu.matmul %1, %105, %cst_36 {dimension_numbers = #tpu.dot_dimension_numbers<[1], [0], [0], [1], [0, 0, 1, 1], [], []>} : vector<16x48xbf16>, vector<48x64xbf16>, vector<16x64xf32> -> vector<16x64xf32>
    %107 = vector.extract_strided_slice %106 {offsets = [0, 0], sizes = [16, 32], strides = [1, 1]} : vector<16x64xf32> to vector<16x32xf32>
    %108 = vector.extract_strided_slice %106 {offsets = [0, 32], sizes = [16, 32], strides = [1, 1]} : vector<16x64xf32> to vector<16x32xf32>
    %cst_37 = arith.constant 9.99999997E-7 : f32
    %109 = vector.broadcast %cst_37 : f32 to vector<16x32xf32>
    %110 = arith.addf %108, %109 : vector<16x32xf32>
    %111 = tpu.reciprocal %110 {approx = true} : vector<16x32xf32> -> vector<16x32xf32>
    %112 = arith.mulf %107, %111 : vector<16x32xf32>
    %113 = arith.addf %92, %112 : vector<16x32xf32>
    %114 = vector.extract_strided_slice %81 {offsets = [0, 0], sizes = [1, 32], strides = [1, 1]} : vector<4x32xf32> to vector<1x32xf32>
    %115 = vector.broadcast %114 : vector<1x32xf32> to vector<16x32xf32>
    %116 = arith.mulf %113, %115 : vector<16x32xf32>
    %117 = vector.extract_strided_slice %81 {offsets = [1, 0], sizes = [1, 32], strides = [1, 1]} : vector<4x32xf32> to vector<1x32xf32>
    %118 = vector.broadcast %117 : vector<1x32xf32> to vector<16x32xf32>
    %119 = arith.addf %116, %118 : vector<16x32xf32>
    %cst_38 = arith.constant 0.000000e+00 : f32
    %120 = vector.broadcast %cst_38 : f32 to vector<16x32xf32>
    %121 = arith.maximumf %119, %120 : vector<16x32xf32>
    %122 = vector.extract_strided_slice %81 {offsets = [2, 0], sizes = [1, 32], strides = [1, 1]} : vector<4x32xf32> to vector<1x32xf32>
    %123 = vector.broadcast %122 : vector<1x32xf32> to vector<48x32xf32>
    %124 = arith.mulf %97, %123 : vector<48x32xf32>
    %125 = vector.extract_strided_slice %81 {offsets = [3, 0], sizes = [1, 32], strides = [1, 1]} : vector<4x32xf32> to vector<1x32xf32>
    %126 = vector.broadcast %125 : vector<1x32xf32> to vector<48x32xf32>
    %127 = arith.addf %124, %126 : vector<48x32xf32>
    %cst_39 = arith.constant 0.000000e+00 : f32
    %128 = vector.broadcast %cst_39 : f32 to vector<48x32xf32>
    %129 = arith.maximumf %127, %128 : vector<48x32xf32>
    %130 = arith.addf %71, %121 : vector<16x32xf32>
    %131 = arith.addf %72, %129 : vector<48x32xf32>
    %c32 = arith.constant 32 : index
    %c0_40 = arith.constant 0 : index
    %132 = vector.load %arg6[%c32, %c0_40] : memref<208x128xf32, #tpu.memory_space<vmem>>, vector<32x128xf32>
    %cst_41 = arith.constant dense<0.000000e+00> : vector<16x128xf32>
    %133 = tpu.matmul %130, %132, %cst_41 {dimension_numbers = #tpu.dot_dimension_numbers<[1], [0], [0], [1], [0, 0, 1, 1], [], []>} : vector<16x32xf32>, vector<32x128xf32>, vector<16x128xf32> -> vector<16x128xf32>
    %c64 = arith.constant 64 : index
    %c0_42 = arith.constant 0 : index
    %134 = vector.load %arg6[%c64, %c0_42] : memref<208x128xf32, #tpu.memory_space<vmem>>, vector<1x128xf32>
    %135 = vector.broadcast %134 : vector<1x128xf32> to vector<16x128xf32>
    %136 = arith.addf %133, %135 : vector<16x128xf32>
    %cst_43 = arith.constant 2.000000e+00 : f32
    %137 = vector.broadcast %cst_43 : f32 to vector<16x128xf32>
    %138 = arith.mulf %136, %137 : vector<16x128xf32>
    %139 = tpu.iota {dimensions = array<i32: 1>} : vector<16x128xi32>
    %c8_i32 = arith.constant 8 : i32
    %140 = vector.broadcast %c8_i32 : i32 to vector<16x128xi32>
    %141 = arith.cmpi slt, %139, %140 : vector<16x128xi32>
    %cst_44 = arith.constant -1.000000e+30 : f32
    %142 = vector.broadcast %cst_44 : f32 to vector<16x128xf32>
    %143 = arith.select %141, %138, %142 : vector<16x128xi1>, vector<16x128xf32>
    %cst_45 = arith.constant dense<0xFF800000> : vector<16xf32>
    %144 = vector.multi_reduction <maximumf>, %143, %cst_45 [1] : vector<16x128xf32> to vector<16xf32>
    %145 = vector.shape_cast %144 : vector<16xf32> to vector<16x1xf32>
    %146 = vector.broadcast %145 : vector<16x1xf32> to vector<16x128xf32>
    %147 = arith.subf %143, %146 : vector<16x128xf32>
    %148 = math.exp %147 : vector<16x128xf32>
    %cst_46 = arith.constant dense<0.000000e+00> : vector<16xf32>
    %149 = vector.multi_reduction <add>, %148, %cst_46 [1] : vector<16x128xf32> to vector<16xf32>
    %150 = vector.shape_cast %149 : vector<16xf32> to vector<16x1xf32>
    %151 = tpu.reciprocal %150 {approx = true} : vector<16x1xf32> -> vector<16x1xf32>
    %152 = vector.broadcast %151 : vector<16x1xf32> to vector<16x128xf32>
    %153 = arith.mulf %148, %152 : vector<16x128xf32>
    %c0_47 = arith.constant 0 : index
    %c0_48 = arith.constant 0 : index
    %154 = vector.load %arg8[%c0_47, %c0_48] : memref<16x128xf32, #tpu.memory_space<vmem>>, vector<16x128xf32>
    tpu.vector_store %arg8[%c0_47, %c0_48], %153 {strides = array<i32>} : memref<16x128xf32, #tpu.memory_space<vmem>>, vector<16x128xf32>,
    %c2 = arith.constant 2 : index
    %c0_49 = arith.constant 0 : index
    %c0_50 = arith.constant 0 : index
    %155 = vector.load %arg4[%c2, %c0_49, %c0_50] : memref<4x64x128xf32, #tpu.memory_space<vmem>>, vector<1x64x128xf32>
    %156 = vector.shape_cast %155 : vector<1x64x128xf32> to vector<64x128xf32>
    %c2_51 = arith.constant 2 : index
    %c0_52 = arith.constant 0 : index
    %c0_53 = arith.constant 0 : index
    %157 = vector.load %arg5[%c2_51, %c0_52, %c0_53] : memref<4x8x128xf32, #tpu.memory_space<vmem>>, vector<1x8x128xf32>
    %158 = vector.shape_cast %157 : vector<1x8x128xf32> to vector<8x128xf32>
    %159 = vector.extract_strided_slice %156 {offsets = [0, 0], sizes = [32, 128], strides = [1, 1]} : vector<64x128xf32> to vector<32x128xf32>
    %160 = vector.extract_strided_slice %156 {offsets = [32, 0], sizes = [32, 32], strides = [1, 1]} : vector<64x128xf32> to vector<32x32xf32>
    %161 = vector.extract_strided_slice %158 {offsets = [0, 0], sizes = [1, 128], strides = [1, 1]} : vector<8x128xf32> to vector<1x128xf32>
    %162 = vector.extract_strided_slice %158 {offsets = [1, 0], sizes = [1, 32], strides = [1, 1]} : vector<8x128xf32> to vector<1x32xf32>
    %163 = vector.extract_strided_slice %158 {offsets = [2, 0], sizes = [4, 32], strides = [1, 1]} : vector<8x128xf32> to vector<4x32xf32>
    %cst_54 = arith.constant dense<0.000000e+00> : vector<16x128xf32>
    %164 = tpu.matmul %130, %159, %cst_54 {dimension_numbers = #tpu.dot_dimension_numbers<[1], [0], [0], [1], [0, 0, 1, 1], [], []>} : vector<16x32xf32>, vector<32x128xf32>, vector<16x128xf32> -> vector<16x128xf32>
    %165 = vector.broadcast %161 : vector<1x128xf32> to vector<16x128xf32>
    %166 = arith.addf %164, %165 : vector<16x128xf32>
    %cst_55 = arith.constant dense<0.000000e+00> : vector<48x32xf32>
    %167 = tpu.matmul %131, %160, %cst_55 {dimension_numbers = #tpu.dot_dimension_numbers<[1], [0], [0], [1], [0, 0, 1, 1], [], []>} : vector<48x32xf32>, vector<32x32xf32>, vector<48x32xf32> -> vector<48x32xf32>
    %168 = vector.broadcast %162 : vector<1x32xf32> to vector<48x32xf32>
    %169 = arith.addf %167, %168 : vector<48x32xf32>
    %170 = arith.truncf %166 : vector<16x128xf32> to vector<16x128xbf16>
    %cst_56 = arith.constant dense<0.000000e+00> : vector<96x128xf32>
    %171 = tpu.matmul %0, %170, %cst_56 {dimension_numbers = #tpu.dot_dimension_numbers<[1], [0], [0], [1], [0, 0, 1, 1], [], []>} : vector<96x16xbf16>, vector<16x128xbf16>, vector<96x128xf32> -> vector<96x128xf32>
    %172 = vector.extract_strided_slice %171 {offsets = [0, 0], sizes = [48, 128], strides = [1, 1]} : vector<96x128xf32> to vector<48x128xf32>
    %173 = vector.extract_strided_slice %171 {offsets = [48, 0], sizes = [48, 128], strides = [1, 1]} : vector<96x128xf32> to vector<48x128xf32>
    %174 = vector.extract_strided_slice %166 {offsets = [0, 0], sizes = [16, 32], strides = [1, 1]} : vector<16x128xf32> to vector<16x32xf32>
    %175 = vector.extract_strided_slice %172 {offsets = [0, 32], sizes = [48, 32], strides = [1, 1]} : vector<48x128xf32> to vector<48x32xf32>
    %176 = vector.extract_strided_slice %172 {offsets = [0, 64], sizes = [48, 32], strides = [1, 1]} : vector<48x128xf32> to vector<48x32xf32>
    %177 = vector.extract_strided_slice %173 {offsets = [0, 96], sizes = [48, 32], strides = [1, 1]} : vector<48x128xf32> to vector<48x32xf32>
    %178 = arith.addf %169, %176 : vector<48x32xf32>
    %179 = arith.addf %178, %177 : vector<48x32xf32>
    %180 = arith.negf %179 : vector<48x32xf32>
    %181 = math.exp %180 : vector<48x32xf32>
    %cst_57 = arith.constant 1.000000e+00 : f32
    %182 = vector.broadcast %cst_57 : f32 to vector<48x32xf32>
    %183 = arith.addf %182, %181 : vector<48x32xf32>
    %184 = arith.divf %182, %183 : vector<48x32xf32>
    %185 = arith.mulf %184, %175 : vector<48x32xf32>
    %186 = tpu.concatenate %185, %184 in 1 : vector<48x32xf32>, vector<48x32xf32> -> vector<48x64xf32>
    %187 = arith.truncf %186 : vector<48x64xf32> to vector<48x64xbf16>
    %cst_58 = arith.constant dense<0.000000e+00> : vector<16x64xf32>
    %188 = tpu.matmul %1, %187, %cst_58 {dimension_numbers = #tpu.dot_dimension_numbers<[1], [0], [0], [1], [0, 0, 1, 1], [], []>} : vector<16x48xbf16>, vector<48x64xbf16>, vector<16x64xf32> -> vector<16x64xf32>
    %189 = vector.extract_strided_slice %188 {offsets = [0, 0], sizes = [16, 32], strides = [1, 1]} : vector<16x64xf32> to vector<16x32xf32>
    %190 = vector.extract_strided_slice %188 {offsets = [0, 32], sizes = [16, 32], strides = [1, 1]} : vector<16x64xf32> to vector<16x32xf32>
    %cst_59 = arith.constant 9.99999997E-7 : f32
    %191 = vector.broadcast %cst_59 : f32 to vector<16x32xf32>
    %192 = arith.addf %190, %191 : vector<16x32xf32>
    %193 = tpu.reciprocal %192 {approx = true} : vector<16x32xf32> -> vector<16x32xf32>
    %194 = arith.mulf %189, %193 : vector<16x32xf32>
    %195 = arith.addf %174, %194 : vector<16x32xf32>
    %196 = vector.extract_strided_slice %163 {offsets = [0, 0], sizes = [1, 32], strides = [1, 1]} : vector<4x32xf32> to vector<1x32xf32>
    %197 = vector.broadcast %196 : vector<1x32xf32> to vector<16x32xf32>
    %198 = arith.mulf %195, %197 : vector<16x32xf32>
    %199 = vector.extract_strided_slice %163 {offsets = [1, 0], sizes = [1, 32], strides = [1, 1]} : vector<4x32xf32> to vector<1x32xf32>
    %200 = vector.broadcast %199 : vector<1x32xf32> to vector<16x32xf32>
    %201 = arith.addf %198, %200 : vector<16x32xf32>
    %cst_60 = arith.constant 0.000000e+00 : f32
    %202 = vector.broadcast %cst_60 : f32 to vector<16x32xf32>
    %203 = arith.maximumf %201, %202 : vector<16x32xf32>
    %204 = vector.extract_strided_slice %163 {offsets = [2, 0], sizes = [1, 32], strides = [1, 1]} : vector<4x32xf32> to vector<1x32xf32>
    %205 = vector.broadcast %204 : vector<1x32xf32> to vector<48x32xf32>
    %206 = arith.mulf %179, %205 : vector<48x32xf32>
    %207 = vector.extract_strided_slice %163 {offsets = [3, 0], sizes = [1, 32], strides = [1, 1]} : vector<4x32xf32> to vector<1x32xf32>
    %208 = vector.broadcast %207 : vector<1x32xf32> to vector<48x32xf32>
    %209 = arith.addf %206, %208 : vector<48x32xf32>
    %cst_61 = arith.constant 0.000000e+00 : f32
    %210 = vector.broadcast %cst_61 : f32 to vector<48x32xf32>
    %211 = arith.maximumf %209, %210 : vector<48x32xf32>
    %212 = arith.addf %130, %203 : vector<16x32xf32>
    %213 = arith.addf %131, %211 : vector<48x32xf32>
    %c3 = arith.constant 3 : index
    %c0_62 = arith.constant 0 : index
    %c0_63 = arith.constant 0 : index
    %214 = vector.load %arg4[%c3, %c0_62, %c0_63] : memref<4x64x128xf32, #tpu.memory_space<vmem>>, vector<1x64x128xf32>
    %215 = vector.shape_cast %214 : vector<1x64x128xf32> to vector<64x128xf32>
    %c3_64 = arith.constant 3 : index
    %c0_65 = arith.constant 0 : index
    %c0_66 = arith.constant 0 : index
    %216 = vector.load %arg5[%c3_64, %c0_65, %c0_66] : memref<4x8x128xf32, #tpu.memory_space<vmem>>, vector<1x8x128xf32>
    %217 = vector.shape_cast %216 : vector<1x8x128xf32> to vector<8x128xf32>
    %218 = vector.extract_strided_slice %215 {offsets = [0, 0], sizes = [32, 128], strides = [1, 1]} : vector<64x128xf32> to vector<32x128xf32>
    %219 = vector.extract_strided_slice %215 {offsets = [32, 0], sizes = [32, 32], strides = [1, 1]} : vector<64x128xf32> to vector<32x32xf32>
    %220 = vector.extract_strided_slice %217 {offsets = [0, 0], sizes = [1, 128], strides = [1, 1]} : vector<8x128xf32> to vector<1x128xf32>
    %221 = vector.extract_strided_slice %217 {offsets = [1, 0], sizes = [1, 32], strides = [1, 1]} : vector<8x128xf32> to vector<1x32xf32>
    %222 = vector.extract_strided_slice %217 {offsets = [2, 0], sizes = [4, 32], strides = [1, 1]} : vector<8x128xf32> to vector<4x32xf32>
    %cst_67 = arith.constant dense<0.000000e+00> : vector<16x128xf32>
    %223 = tpu.matmul %212, %218, %cst_67 {dimension_numbers = #tpu.dot_dimension_numbers<[1], [0], [0], [1], [0, 0, 1, 1], [], []>} : vector<16x32xf32>, vector<32x128xf32>, vector<16x128xf32> -> vector<16x128xf32>
    %224 = vector.broadcast %220 : vector<1x128xf32> to vector<16x128xf32>
    %225 = arith.addf %223, %224 : vector<16x128xf32>
    %cst_68 = arith.constant dense<0.000000e+00> : vector<48x32xf32>
    %226 = tpu.matmul %213, %219, %cst_68 {dimension_numbers = #tpu.dot_dimension_numbers<[1], [0], [0], [1], [0, 0, 1, 1], [], []>} : vector<48x32xf32>, vector<32x32xf32>, vector<48x32xf32> -> vector<48x32xf32>
    %227 = vector.broadcast %221 : vector<1x32xf32> to vector<48x32xf32>
    %228 = arith.addf %226, %227 : vector<48x32xf32>
    %229 = arith.truncf %225 : vector<16x128xf32> to vector<16x128xbf16>
    %cst_69 = arith.constant dense<0.000000e+00> : vector<96x128xf32>
    %230 = tpu.matmul %0, %229, %cst_69 {dimension_numbers = #tpu.dot_dimension_numbers<[1], [0], [0], [1], [0, 0, 1, 1], [], []>} : vector<96x16xbf16>, vector<16x128xbf16>, vector<96x128xf32> -> vector<96x128xf32>
    %231 = vector.extract_strided_slice %230 {offsets = [0, 0], sizes = [48, 128], strides = [1, 1]} : vector<96x128xf32> to vector<48x128xf32>
    %232 = vector.extract_strided_slice %230 {offsets = [48, 0], sizes = [48, 128], strides = [1, 1]} : vector<96x128xf32> to vector<48x128xf32>
    %233 = vector.extract_strided_slice %225 {offsets = [0, 0], sizes = [16, 32], strides = [1, 1]} : vector<16x128xf32> to vector<16x32xf32>
    %234 = vector.extract_strided_slice %231 {offsets = [0, 32], sizes = [48, 32], strides = [1, 1]} : vector<48x128xf32> to vector<48x32xf32>
    %235 = vector.extract_strided_slice %231 {offsets = [0, 64], sizes = [48, 32], strides = [1, 1]} : vector<48x128xf32> to vector<48x32xf32>
    %236 = vector.extract_strided_slice %232 {offsets = [0, 96], sizes = [48, 32], strides = [1, 1]} : vector<48x128xf32> to vector<48x32xf32>
    %237 = arith.addf %228, %235 : vector<48x32xf32>
    %238 = arith.addf %237, %236 : vector<48x32xf32>
    %239 = arith.negf %238 : vector<48x32xf32>
    %240 = math.exp %239 : vector<48x32xf32>
    %cst_70 = arith.constant 1.000000e+00 : f32
    %241 = vector.broadcast %cst_70 : f32 to vector<48x32xf32>
    %242 = arith.addf %241, %240 : vector<48x32xf32>
    %243 = arith.divf %241, %242 : vector<48x32xf32>
    %244 = arith.mulf %243, %234 : vector<48x32xf32>
    %245 = tpu.concatenate %244, %243 in 1 : vector<48x32xf32>, vector<48x32xf32> -> vector<48x64xf32>
    %246 = arith.truncf %245 : vector<48x64xf32> to vector<48x64xbf16>
    %cst_71 = arith.constant dense<0.000000e+00> : vector<16x64xf32>
    %247 = tpu.matmul %1, %246, %cst_71 {dimension_numbers = #tpu.dot_dimension_numbers<[1], [0], [0], [1], [0, 0, 1, 1], [], []>} : vector<16x48xbf16>, vector<48x64xbf16>, vector<16x64xf32> -> vector<16x64xf32>
    %248 = vector.extract_strided_slice %247 {offsets = [0, 0], sizes = [16, 32], strides = [1, 1]} : vector<16x64xf32> to vector<16x32xf32>
    %249 = vector.extract_strided_slice %247 {offsets = [0, 32], sizes = [16, 32], strides = [1, 1]} : vector<16x64xf32> to vector<16x32xf32>
    %cst_72 = arith.constant 9.99999997E-7 : f32
    %250 = vector.broadcast %cst_72 : f32 to vector<16x32xf32>
    %251 = arith.addf %249, %250 : vector<16x32xf32>
    %252 = tpu.reciprocal %251 {approx = true} : vector<16x32xf32> -> vector<16x32xf32>
    %253 = arith.mulf %248, %252 : vector<16x32xf32>
    %254 = arith.addf %233, %253 : vector<16x32xf32>
    %255 = vector.extract_strided_slice %222 {offsets = [0, 0], sizes = [1, 32], strides = [1, 1]} : vector<4x32xf32> to vector<1x32xf32>
    %256 = vector.broadcast %255 : vector<1x32xf32> to vector<16x32xf32>
    %257 = arith.mulf %254, %256 : vector<16x32xf32>
    %258 = vector.extract_strided_slice %222 {offsets = [1, 0], sizes = [1, 32], strides = [1, 1]} : vector<4x32xf32> to vector<1x32xf32>
    %259 = vector.broadcast %258 : vector<1x32xf32> to vector<16x32xf32>
    %260 = arith.addf %257, %259 : vector<16x32xf32>
    %cst_73 = arith.constant 0.000000e+00 : f32
    %261 = vector.broadcast %cst_73 : f32 to vector<16x32xf32>
    %262 = arith.maximumf %260, %261 : vector<16x32xf32>
    %263 = arith.addf %212, %262 : vector<16x32xf32>
    %264 = arith.truncf %263 : vector<16x32xf32> to vector<16x32xbf16>
    %cst_74 = arith.constant dense<0.000000e+00> : vector<96x32xf32>
    %265 = tpu.matmul %0, %264, %cst_74 {dimension_numbers = #tpu.dot_dimension_numbers<[1], [0], [0], [1], [0, 0, 1, 1], [], []>} : vector<96x16xbf16>, vector<16x32xbf16>, vector<96x32xf32> -> vector<96x32xf32>
    %266 = vector.extract_strided_slice %265 {offsets = [0, 0], sizes = [48, 32], strides = [1, 1]} : vector<96x32xf32> to vector<48x32xf32>
    %267 = vector.extract_strided_slice %265 {offsets = [48, 0], sizes = [48, 32], strides = [1, 1]} : vector<96x32xf32> to vector<48x32xf32>
    %268 = tpu.concatenate %266, %267 in 1 : vector<48x32xf32>, vector<48x32xf32> -> vector<48x64xf32>
    %c72 = arith.constant 72 : index
    %c0_75 = arith.constant 0 : index
    %269 = vector.load %arg6[%c72, %c0_75] : memref<208x128xf32, #tpu.memory_space<vmem>>, vector<64x32xf32>
    %cst_76 = arith.constant dense<0.000000e+00> : vector<48x32xf32>
    %270 = tpu.matmul %268, %269, %cst_76 {dimension_numbers = #tpu.dot_dimension_numbers<[1], [0], [0], [1], [0, 0, 1, 1], [], []>} : vector<48x64xf32>, vector<64x32xf32>, vector<48x32xf32> -> vector<48x32xf32>
    %c136 = arith.constant 136 : index
    %c0_77 = arith.constant 0 : index
    %271 = vector.load %arg6[%c136, %c0_77] : memref<208x128xf32, #tpu.memory_space<vmem>>, vector<1x32xf32>
    %272 = vector.broadcast %271 : vector<1x32xf32> to vector<48x32xf32>
    %273 = arith.addf %270, %272 : vector<48x32xf32>
    %cst_78 = arith.constant 0.000000e+00 : f32
    %274 = vector.broadcast %cst_78 : f32 to vector<48x32xf32>
    %275 = arith.maximumf %273, %274 : vector<48x32xf32>
    %c144 = arith.constant 144 : index
    %c0_79 = arith.constant 0 : index
    %276 = vector.load %arg6[%c144, %c0_79] : memref<208x128xf32, #tpu.memory_space<vmem>>, vector<32x16xf32>
    %cst_80 = arith.constant dense<0.000000e+00> : vector<48x16xf32>
    %277 = tpu.matmul %275, %276, %cst_80 {dimension_numbers = #tpu.dot_dimension_numbers<[1], [0], [0], [1], [0, 0, 1, 1], [], []>} : vector<48x32xf32>, vector<32x16xf32>, vector<48x16xf32> -> vector<48x16xf32>
    %c176 = arith.constant 176 : index
    %c0_81 = arith.constant 0 : index
    %278 = vector.load %arg6[%c176, %c0_81] : memref<208x128xf32, #tpu.memory_space<vmem>>, vector<1x16xf32>
    %279 = vector.broadcast %278 : vector<1x16xf32> to vector<48x16xf32>
    %280 = arith.addf %277, %279 : vector<48x16xf32>
    %cst_82 = arith.constant 0.000000e+00 : f32
    %281 = vector.broadcast %cst_82 : f32 to vector<48x16xf32>
    %282 = arith.maximumf %280, %281 : vector<48x16xf32>
    %c184 = arith.constant 184 : index
    %c0_83 = arith.constant 0 : index
    %283 = vector.load %arg6[%c184, %c0_83] : memref<208x128xf32, #tpu.memory_space<vmem>>, vector<16x128xf32>
    %cst_84 = arith.constant dense<0.000000e+00> : vector<48x128xf32>
    %284 = tpu.matmul %282, %283, %cst_84 {dimension_numbers = #tpu.dot_dimension_numbers<[1], [0], [0], [1], [0, 0, 1, 1], [], []>} : vector<48x16xf32>, vector<16x128xf32>, vector<48x128xf32> -> vector<48x128xf32>
    %c200 = arith.constant 200 : index
    %c0_85 = arith.constant 0 : index
    %285 = vector.load %arg6[%c200, %c0_85] : memref<208x128xf32, #tpu.memory_space<vmem>>, vector<1x128xf32>
    %286 = vector.broadcast %285 : vector<1x128xf32> to vector<48x128xf32>
    %287 = arith.addf %284, %286 : vector<48x128xf32>
    %c0_86 = arith.constant 0 : index
    %c0_87 = arith.constant 0 : index
    %288 = vector.load %arg7[%c0_86, %c0_87] : memref<48x128xf32, #tpu.memory_space<vmem>>, vector<48x128xf32>
    tpu.vector_store %arg7[%c0_86, %c0_87], %287 {strides = array<i32>} : memref<48x128xf32, #tpu.memory_space<vmem>>, vector<48x128xf32>,
    return
  }
}

</mosaic_0001>

<bundles_post_ra>
// kernel: tpu_custom_call.1
= control target key start
LH: loop header
LB: loop body
LE: loop exit
PB: predicated region body
PF: predicated region fallthrough
CT: control target
= control target key end

     0   :  { %14 = vsyncpa [#allocation3], 0  ;;  %s5034_s0 = inlined_call_operand.vmem [shape: f32[16,2], index: 0, kind: input, shape index: {}]   ;;  %s5035_s1 = inlined_call_operand.vmem [shape: f32[48,1], index: 1, kind: input, shape index: {}]   ;;  %s5036_s2 = inlined_call_operand.vmem [shape: bf16[96,16], index: 2, kind: input, shape index: {}]   ;;  %s5037_s3 = inlined_call_operand.vmem [shape: bf16[16,48], index: 3, kind: input, shape index: {}]   ;;  %s5038_s4 = inlined_call_operand.hbm [shape: f32[4,64,128], index: 4, kind: input, shape index: {}]   ;;  %s5039_s5 = inlined_call_operand.vmem [shape: f32[4,8,128], index: 5, kind: input, shape index: {}]   ;;  %s5040_s6 = inlined_call_operand.hbm [shape: f32[208,128], index: 6, kind: input, shape index: {}]   ;;  %s5041_s7 = inlined_call_operand.hbm [shape: f32[48,128], index: 7, kind: output, shape index: {0}]   ;;  %s5042_s8 = inlined_call_operand.hbm [shape: f32[16,128], index: 8, kind: output, shape index: {1}]  }
   0x1   :  { %15 = vsyncpa [#allocation6], 0 }
   0x2   :  { %16 = vsyncpa [#allocation4], 0 }
   0x3   :  { %17 = vsyncpa [#allocation9], 0  ;;  %s4184_s27 = smov [#allocation2]   ;;  %s4088_s9 = scalar_lea.hbm %s5038_s4, 4096 }
   0x4   :  { %s31_s28 = sshll.u32 %s4184_s27, 4  ;;  %p4089_p0 = scmp.ne.s32.totalorder %s5038_s4, %s4088_s9  ;;  %s32_s28 = int_to_ptr.vmem [resolvable:$true] %s31_s28 }
   0x5   :  { %p4092_p1 = scmp.lt.u32.totalorder %s4088_s9, %s5038_s4 }
   0x7   :  { %p4094_p2 = pnand %p4092_p1, %p4089_p0 }
   0x9   :  { %4097 = shalt.err (!%p4094_p2)
}
   0xa   :  { %s4098_s14 = scalar_lea.vmem %s32_s28, 4096  ;;  %p4103_p4 = scmp.lt.s32.totalorder %s32_s28, %s32_s28 }
   0xb   :  { %p4099_p3 = scmp.ne.s32.totalorder %s32_s28, %s4098_s14  ;;  %p4104_p5 = scmp.lt.s32.totalorder %s4098_s14, %s4098_s14 }
   0xd   :  { %p4105_p6 = por %p4104_p5, %p4103_p4 }
   0xf   :  { %p4106_p7 = pnand %p4105_p6, %p4099_p3 }
  0x11   :  { %4109 = shalt.err (!%p4106_p7)
}
  0x12   :  { %s4185_s15 = smov 128   ;;  %s4186_s16 = smov 8  }
  0x13   :  { %37 = dma.hbm_to_vmem [thread:$0]  %s5038_s4, 4096, %s32_s28, [#allocation3], %s4185_s15, %s4185_s15, %s4186_s16  }
  0x14   :  { %s4187_s19 = smov [#allocation5]   ;;  %s4110_s23 = scalar_lea.hbm %s5040_s6, 3328 }
  0x15   :  { %s45_s20 = sshll.u32 %s4187_s19, 4  ;;  %p4111_p8 = scmp.ne.s32.totalorder %s5040_s6, %s4110_s23  ;;  %s46_s20 = int_to_ptr.vmem [resolvable:$true] %s45_s20 }
  0x16   :  { %p4114_p9 = scmp.lt.u32.totalorder %s4110_s23, %s5040_s6 }
  0x18   :  { %p4116_p10 = pnand %p4114_p9, %p4111_p8 }
  0x1a   :  { %4119 = shalt.err (!%p4116_p10)
}
  0x1b   :  { %s4120_s29 = scalar_lea.vmem %s46_s20, 3328  ;;  %p4125_p12 = scmp.lt.s32.totalorder %s46_s20, %s46_s20 }
  0x1c   :  { %p4121_p11 = scmp.ne.s32.totalorder %s46_s20, %s4120_s29  ;;  %p4126_p13 = scmp.lt.s32.totalorder %s4120_s29, %s4120_s29 }
  0x1e   :  { %p4127_p0 = por %p4126_p13, %p4125_p12 }
  0x20   :  { %p4128_p1 = pnand %p4127_p0, %p4121_p11 }
  0x22   :  { %4131 = shalt.err (!%p4128_p1)
}
  0x23   :  { %51 = dma.hbm_to_vmem [thread:$0]  %s5040_s6, 3328, %s46_s20, [#allocation6], %s4185_s15, %s4185_s15, %s4186_s16  }
  0x24   :  { %4176 = dma.done.wait [#allocation3], 4096  }
  0x25   :  { %4177 = vsyncadd [#allocation3], 4294963200 }
  0x26   :  { %4178 = dma.done.wait [#allocation6], 3328  }
  0x27   :  { %4179 = vsyncadd [#allocation6], 4294963968  ;;  %vm88_vm0 = vcmask 1041408   ;;  %vm81_vm1 = vcmask 15360   ;;  %v75_v0 = vld [vmem:[#allocation5] sm:$0x3]  ;;  %v306_v41 = vlaneseq }
  0x28   :  { %v73_v1 = vld [vmem:[%s5034_s0] sm:$0xff]  ;;  %v74_v2 = vld [vmem:[%s5034_s0 + $0x8] sm:$0xff]  ;;  %vm198_vm2 = vcmask 1040384   ;;  %3477 = vmatprep.subr.msk.mxu0 %vm88_vm0, %v75_v0  ;;  %vm179_vm3 = vcmask 7168   ;;  %v297_v6 = vld [vmem:[#allocation2] sm:$0xff]  ;;  %vm310_vm4 = vcmask 261120  }
  0x29   :  { %3479 = vmatprep.mubr.msk.f32.mxu0 %vm81_vm1, %v73_v1  ;;  %v173_v3 = vld [vmem:[#allocation5 + $0x10] sm:$0x1]  ;;  %3478 = vmatpush3.msk.msra.mxu0 %vm88_vm0, %v75_v0  ;;  %v168_v5 = vld [vmem:[%s5035_s1 + $0x8] sm:$0xff]  ;;  %v298_v7 = vld [vmem:[#allocation2 + $0x8] sm:$0xff]  ;;  %vm540_vm5 = vcmask 130048   ;;  %v4344_v42 = vshrl.u32 %v306_v41, 7 }
  0x2a   :  { %v167_v4 = vld [vmem:[%s5035_s1] sm:$0xff]  ;;  %3881 = vmatprep.subr.msk.mxu1 %vm198_vm2, %v173_v3  ;;  %3480 = vmatmul.mubr.msk.f32.vlgmr.msra.gmra.mrb[0].mxu0 %vm81_vm1, %v74_v2  ;;  %v3781_v8 = vpack.c.bf16 %v298_v7, %v297_v6  ;;  %v300_v10 = vld [vmem:[#allocation2 + $0x18] sm:$0xff]  ;;  %v169_v12 = vld [vmem:[%s5035_s1 + $0x10] sm:$0xff]  ;;  %s4188_s13 = smov 64   ;;  %s4189_s14 = smov 32   ;;  %vm4192_vm6 = vmmov 0  }
  0x2b   :  { %3482 = vmatprep.subr.msk.mxu0 %vm198_vm2, %v173_v3  ;;  %3484 = vmatprep.mubr.msk.f32.mxu0 %vm179_vm3, %v167_v4  ;;  %v299_v9 = vld [vmem:[#allocation2 + $0x10] sm:$0xff]  ;;  %v170_v13 = vld [vmem:[%s5035_s1 + $0x18] sm:$0xff]  ;;  %v301_v15 = vld [vmem:[#allocation2 + $0x20] sm:$0xff]  ;;  %v4347_v43 = vsub.s32 0, %v4344_v42  ;;  %s4190_s0 = smov 96   ;;  %vm798_vm7 = vcmask 392192  }
  0x2c   :  { %3483 = vmatpush3.msk.msra.mxu0 %vm198_vm2, %v173_v3  ;;  %3882 = vmatpush3.msk.msra.mxu1 %vm198_vm2, %v173_v3  ;;  %v3785_v11 = vpack.c.bf16 %v300_v10, %v299_v9  ;;  %v171_v14 = vld [vmem:[%s5035_s1 + $0x20] sm:$0xff]  ;;  %v302_v16 = vld [vmem:[#allocation2 + $0x28] sm:$0xff]  ;;  %v304_v19 = vld [vmem:[#allocation2 + $0x38] sm:$0xff]  ;;  %vm2770_vm9 = vcmask 523264  }
  0x2d   :  { %3782 = vmatprep.subr.bf16.mxu0 %v3781_v8  ;;  %3487 = vmatprep.mubr.msk.f32.mxu1 %vm179_vm3, %v169_v12  ;;  %v3789_v17 = vpack.c.bf16 %v302_v16, %v301_v15  ;;  %v303_v18 = vld [vmem:[#allocation2 + $0x30] sm:$0xff]  ;;  %v172_v20 = vld [vmem:[%s5035_s1 + $0x28] sm:$0xff]  ;;  %v3178_v22 = vld [vmem:[#allocation5 + $0x8] ss:$0 sm:$0xff]  ;;  %v4430_v16 = vsub.s32 1, %v4344_v42 }
  0x2e   :  { %3485 = vmatmul.mubr.msk.f32.vlgmr.msra.gmra.mrb[2].mxu0 %vm179_vm3, %v168_v5  ;;  %3488 = vmatmul.mubr.msk.f32.vlgmr.msra.gmra.mrb[0].mxu1 %vm179_vm3, %v170_v13  ;;  %v3793_v21 = vpack.c.bf16 %v304_v19, %v303_v18  ;;  %v3182_v26 = vld [vmem:[#allocation5 + $0x18] ss:$0 sm:$0xff]  ;;  %v4323_v32 = vld [vmem:[%s5036_s2] sm:$0xff]   ;;  %v4374_v54 = vld [vmem:[%s5036_s2 + $0x10] sm:$0xff]   ;;  %v4435_v19 = vsub.s32 4, %v4344_v42 }
  0x2f   :  { %3784 = vmatpush3.bf16.msra.mxu0 %v3781_v8  ;;  %3490 = vmatprep.mubr.msk.f32.mxu1 %vm179_vm3, %v171_v14  ;;  %v4352_v44 = vld [vmem:[%s5039_s5] sm:$0xff]  ;;  %v4369_v53 = vld [vmem:[%s5036_s2 + $0x8] sm:$0xff]   ;;  %v4383_v55 = vld [vmem:[%s5036_s2 + $0x18] sm:$0xff]  }
  0x30   :  { %3786 = vmatprep.subr.bf16.mxu0 %v3785_v11  ;;  %3790 = vmatprep.subr.bf16.mxu1 %v3789_v17  ;;  %v309_v45 = vrot.slane %v4352_v44, %v4347_v43  ;;  %v4388_v56 = vld [vmem:[%s5036_s2 + $0x20] sm:$0xff]   ;;  %v4397_v57 = vld [vmem:[%s5036_s2 + $0x28] sm:$0xff]   ;;  %v912_v62 = vld [vmem:[#allocation2 + $0x60] sm:$0xff]  ;;  %v395_v18 = vrot.slane %v4352_v44, %v4430_v16 }
  0x31   :  { %3792 = vmatpush3.bf16.msra.mxu1 %v3789_v17  ;;  %v913_v63 = vld [vmem:[#allocation2 + $0x68] sm:$0xff]  ;;  %v914_v5 = vld [vmem:[#allocation2 + $0x70] sm:$0xff]  ;;  %v915_v6 = vld [vmem:[#allocation2 + $0x78] sm:$0xff] }
  0x32   :  { %3491 = vmatmul.mubr.msk.f32.gmra.mrb[2].mxu1 %vm179_vm3, %v172_v20  ;;  %3794 = vmatprep.subr.bf16.mxu1 %v3793_v21  ;;  %v3805_v1 = vpack.c.bf16 %v913_v63, %v912_v62  ;;  %v3809_v7 = vpack.c.bf16 %v915_v6, %v914_v5 }
  0x33   :  { %3788 = vmatpush3.bf16.msra.mxu0 %v3785_v11 }
  0x35   :  { %3796 = vmatpush3.bf16.msra.mxu1 %v3793_v21 }
  0xfd   :  { %v3481_v23 = vpop.f32.mrb[0].mxu0 }
  0xfe   :  { %v158_v24 = vpop.f32.mrb[1].mxu0  ;;  %v4306_v27 = vadd.f32 %v3481_v23, %v3178_v22 }
  0xff   :  { %v4304_v25 = vadd.f32 %v3178_v22, %v158_v24  ;;  %v4438_v22 = vsub.s32 5, %v4344_v42 }
 0x101   :  { %3501 = vmatprep.mubr.msk.f32.mxu0 %vm310_vm4, %v4304_v25  ;;  %v3486_v28 = vpop.f32.mrb[2].mxu0  ;;  %v3489_v33 = vpop.f32.mrb[0].mxu1 }
 0x102   :  { %3502 = vmatmul.mubr.msk.f32.vlgmr.msra.gmra.mrb[4].mxu0 %vm310_vm4, %v4306_v27  ;;  %v4312_v29 = vadd.f32 %v3486_v28, %v3182_v26  ;;  %v268_v30 = vpop.f32.mrb[3].mxu0  ;;  %v4327_v34 = vadd.f32 %v3489_v33, %v3182_v26  ;;  %v278_v35 = vpop.f32.mrb[1].mxu1  ;;  %v4445_v33 = vrot.slane %v4352_v44, %v4438_v22 }
 0x103   :  { %v4314_v31 = vadd.f32 %v3182_v26, %v268_v30  ;;  %3523 = vmatprep.mubr.msk.bf16.mxu0 %vm540_vm5, %v4323_v32  ;;  %v4329_v36 = vadd.f32 %v3182_v26, %v278_v35 }
 0x105   :  { %3512 = vmatprep.mubr.msk.f32.mxu1 %vm310_vm4, %v4314_v31  ;;  %v3492_v37 = vpop.f32.mrb[2].mxu1 }
 0x106   :  { %3513 = vmatmul.mubr.msk.f32.vlgmr.msra.gmra.mrb[4].mxu1 %vm310_vm4, %v4312_v29  ;;  %v288_v38 = vpop.f32.mrb[3].mxu1  ;;  %v4337_v40 = vadd.f32 %v3492_v37, %v3182_v26 }
 0x107   :  { %3515 = vmatprep.mubr.msk.f32.mxu1 %vm310_vm4, %v4329_v36  ;;  %v4333_v39 = vadd.f32 %v3182_v26, %v288_v38  ;;  %v876_v26 = vrot.slane %v4352_v44, %v4435_v19 }
 0x10a   :  { %3516 = vmatmul.mubr.msk.f32.gmra.mrb[6].mxu1 %vm310_vm4, %v4327_v34 }
 0x10b   :  { %3518 = vmatprep.mubr.msk.f32.mxu1 %vm310_vm4, %v4333_v39 }
 0x10e   :  { %3519 = vmatmul.mubr.msk.f32.gmra.mrb[8].mxu1 %vm310_vm4, %v4337_v40 }
 0x1d5   :  { %v3503_v46 = vpop.f32.mrb[4].mxu0 }
 0x1d6   :  { %v4356_v47 = vadd.f32 %v3503_v46, %v309_v45  ;;  %v383_v48 = vpop.f32.mrb[5].mxu0 }
 0x1d7   :  { %v4358_v49 = vadd.f32 %v383_v48, %v309_v45 }
 0x1d9   :  { %v509_v50 = vpack.c.bf16 %v4356_v47, %v4358_v49  ;;  %v4362_v51 = vpop.f32.mrb[4].mxu1 }
 0x1da   :  { %v4364_v52 = vpop.f32.mrb[5].mxu1  ;;  %v486_v35 = vadd.f32 %v4362_v51, %v395_v18 }
 0x1db   :  { %3521 = vmatprep.subr.bf16.mxu0 %v509_v50  ;;  %v481_v23 = vadd.f32 %v4364_v52, %v395_v18 }
 0x1dc   :  { %3522 = vmatpush3.bf16.msra.mxu0 %v509_v50 }
 0x1dd   :  { %v4401_v58 = vpop.f32.mrb[6].mxu1  ;;  %3806 = vmatprep.subr.bf16.mxu0 %v3805_v1 }
 0x1de   :  { %v490_v59 = vpop.f32.mrb[7].mxu1 }
 0x1df   :  { %3524 = vmatmul.mubr.msk.bf16.vlgmr.msra.gmra.mrb[8].mxu0 %vm540_vm5, %v4369_v53  ;;  %v491_v48 = vadd.f32 %v490_v59, %v395_v18 }
 0x1e0   :  { %3527 = vmatprep.mubr.msk.bf16.mxu0 %vm540_vm5, %v4374_v54  ;;  %3808 = vmatpush3.bf16.msra.mxu0 %v3805_v1 }
 0x1e1   :  { %v4403_v60 = vpop.f32.mrb[8].mxu1  ;;  %3810 = vmatprep.subr.bf16.mxu0 %v3809_v7 }
 0x1e2   :  { %v4405_v61 = vpop.f32.mrb[9].mxu1 }
 0x1e3   :  { %v501_v5 = vadd.f32 %v4405_v61, %v395_v18 }
 0x1e4   :  { %3812 = vmatpush3.bf16.msra.mxu0 %v3809_v7 }
 0x1e7   :  { %3528 = vmatmul.mubr.msk.bf16.gmra.mrb[12].mxu0 %vm540_vm5, %v4383_v55 }
 0x1e8   :  { %3531 = vmatprep.mubr.msk.bf16.mxu0 %vm540_vm5, %v4388_v56 }
 0x1ef   :  { %3532 = vmatmul.mubr.msk.bf16.gmra.mrb[16].mxu0 %vm540_vm5, %v4397_v57 }
 0x2b2   :  { %v3525_v0 = vpop.f32.mrb[8].mxu0 }
 0x2b3   :  { %650 = vrot.lane.b32.xlu0 %v3525_v0, %s4188_s13  ;;  %v593_v2 = vpop.f32.mrb[9].mxu0 }
 0x2b4   :  { %v3526_v3 = vpop.f32.mrb[10].mxu0 }
 0x2b5   :  { %652 = vrot.lane.b32.xlu1 %v3526_v3, %s4188_s13  ;;  %v596_v4 = vpop.f32.mrb[11].mxu0 }
 0x2b7   :  { %646 = vrot.lane.b32.xlu0 %v593_v2, %s4188_s13 }
 0x2ba   :  { %v3529_v8 = vpop.f32.mrb[12].mxu0 }
 0x2bb   :  { %648 = vrot.lane.b32.xlu0 %v596_v4, %s4188_s13  ;;  %676 = vrot.lane.b32.xlu1 %v3529_v8, %s4189_s14  ;;  %v4412_v9 = vpop.f32.mrb[13].mxu0 }
 0x2bc   :  { %v3530_v10 = vpop.f32.mrb[14].mxu0 }
 0x2bd   :  { %v4414_v11 = vpop.f32.mrb[15].mxu0 }
 0x2bf   :  { %654 = vrot.lane.b32.xlu0 %v4412_v9, %s4188_s13  ;;  %678 = vrot.lane.b32.xlu1 %v3530_v10, %s4189_s14 }
 0x2c2   :  { %v3533_v12 = vpop.f32.mrb[16].mxu0 }
 0x2c3   :  { %656 = vrot.lane.b32.xlu1 %v4414_v11, %s4188_s13  ;;  %v625_v13 = vpop.f32.mrb[17].mxu0 }
 0x2c4   :  { %680 = vrot.lane.b32.xlu0 %v625_v13, %s4189_s14  ;;  %v3534_v14 = vpop.f32.mrb[18].mxu0 }
 0x2c5   :  { %v628_v15 = vpop.f32.mrb[19].mxu0 }
 0x2c7   :  { %682 = vrot.lane.b32.xlu1 %v628_v15, %s4189_s14 }
 0x2c8   :  { %684 = vrot.lane.b32.xlu0 %v3533_v12, %s4189_s14  ;;  %v506_v12 = vadd.f32 %v4403_v60, %v395_v18 }
 0x2cb   :  { %686 = vrot.lane.b32.xlu1 %v3534_v14, %s4189_s14 }
 0x2cc   :  { %736 = vrot.lane.b32.xlu0 %v593_v2, %s4190_s0 }
 0x2cf   :  { %738 = vrot.lane.b32.xlu1 %v596_v4, %s4190_s0 }
 0x2d0   :  { %742 = vrot.lane.b32.xlu0 %v3526_v3, %s4190_s0 }
 0x2d3   :  { %740 = vrot.lane.b32.xlu1 %v3525_v0, %s4190_s0  ;;  %v496_v0 = vadd.f32 %v4401_v58, %v395_v18 }
 0x325   :  { %v651_v17 = vpop.permute.xlu0 %650 }
 0x326   :  { %v666_v4 = vadd.f32 %v651_v17, %v491_v48 }
 0x327   :  { %v653_v20 = vpop.permute.xlu1 %652 }
 0x328   :  { %v667_v10 = vadd.f32 %v653_v20, %v496_v0 }
 0x329   :  { %v647_v21 = vpop.permute.xlu0 %646 }
 0x32a   :  { %v664_v24 = vadd.f32 %v647_v21, %v481_v23 }
 0x32d   :  { %v649_v28 = vpop.permute.xlu0 %648  ;;  %v677_v30 = vpop.permute.xlu1 %676 }
 0x32e   :  { %v694_v37 = vadd.f32 %v677_v30, %v664_v24  ;;  %v665_v38 = vadd.f32 %v649_v28, %v486_v35 }
 0x330   :  { %v3210_v45 = vmul.f32 -1.442695, %v694_v37  ;;  %v877_v46 = vmul.f32 %v876_v26, %v694_v37 }
 0x331   :  { %v655_v50 = vpop.permute.xlu0 %654  ;;  %v679_v62 = vpop.permute.xlu1 %678 }
 0x332   :  { %3961 = vpow2.f32 %v3210_v45  ;;  %v887_v52 = vadd.f32 %v4445_v33, %v877_v46  ;;  %v695_v63 = vadd.f32 %v679_v62, %v665_v38  ;;  %v668_v58 = vadd.f32 %v655_v50, %v501_v5 }
 0x334   :  { %v893_v1 = vmax.f32 %v887_v52, 0.0  ;;  %v3211_v2 = vmul.f32 -1.442695, %v695_v63  ;;  %v878_v3 = vmul.f32 %v876_v26, %v695_v63 }
 0x335   :  { %v657_v51 = vpop.permute.xlu1 %656 }
 0x336   :  { %v4452_v6 = vadd.f32 %v893_v1, %v4314_v31  ;;  %3963 = vpow2.f32 %v3211_v2  ;;  %v888_v59 = vadd.f32 %v4445_v33, %v878_v3  ;;  %v681_v7 = vpop.permute.xlu0 %680  ;;  %v669_v28 = vadd.f32 %v657_v51, %v506_v12 }
 0x337   :  { %v696_v8 = vadd.f32 %v681_v7, %v666_v4 }
 0x338   :  { %v894_v13 = vmax.f32 %v888_v59, 0.0  ;;  %3564 = vmatprep.mubr.msk.f32.mxu0 %vm310_vm4, %v4452_v6 }
 0x339   :  { %v3212_v14 = vmul.f32 -1.442695, %v696_v8  ;;  %v879_v15 = vmul.f32 %v876_v26, %v696_v8  ;;  %v683_v61 = vpop.permute.xlu1 %682 }
 0x33a   :  { %v4459_v17 = vadd.f32 %v894_v13, %v4312_v29  ;;  %v697_v31 = vadd.f32 %v683_v61, %v667_v10  ;;  %v685_v21 = vpop.permute.xlu0 %684 }
 0x33b   :  { %3965 = vpow2.f32 %v3212_v14  ;;  %v889_v23 = vadd.f32 %v4445_v33, %v879_v15  ;;  %v698_v24 = vadd.f32 %v685_v21, %v668_v58 }
 0x33c   :  { %v3962_v20 = vpop.eup %3961  ;;  %v3213_v60 = vmul.f32 -1.442695, %v697_v31  ;;  %v880_v18 = vmul.f32 %v876_v26, %v697_v31  ;;  %3565 = vmatmul.mubr.msk.f32.vlgmr.msra.gmra.mrb[6].mxu0 %vm310_vm4, %v4459_v17 }
 0x33d   :  { %v718_v30 = vadd.f32 1.0, %v3962_v20  ;;  %v895_v35 = vmax.f32 %v889_v23, 0.0  ;;  %v3214_v37 = vmul.f32 -1.442695, %v698_v24  ;;  %v881_v38 = vmul.f32 %v876_v26, %v698_v24  ;;  %v687_v45 = vpop.permute.xlu1 %686 }
 0x33e   :  { %3967 = vpow2.f32 %v3213_v60  ;;  %v890_v29 = vadd.f32 %v4445_v33, %v880_v18  ;;  %v699_v46 = vadd.f32 %v687_v45, %v669_v28 }
 0x33f   :  { %v4466_v48 = vadd.f32 %v895_v35, %v4329_v36  ;;  %v891_v50 = vadd.f32 %v4445_v33, %v881_v38  ;;  %3969 = vpow2.f32 %v3214_v37 }
 0x340   :  { %v3964_v62 = vpop.eup %3963  ;;  %v896_v52 = vmax.f32 %v890_v29, 0.0  ;;  %v3215_v63 = vmul.f32 -1.442695, %v699_v46  ;;  %v882_v0 = vmul.f32 %v876_v26, %v699_v46  ;;  %3971 = vrcp.f32 %v718_v30 }
 0x341   :  { %v719_v1 = vadd.f32 1.0, %v3964_v62  ;;  %v897_v2 = vmax.f32 %v891_v50, 0.0  ;;  %3567 = vmatprep.mubr.msk.f32.mxu0 %vm310_vm4, %v4466_v48  ;;  %v739_v20 = vpop.permute.xlu1 %738 }
 0x342   :  { %v4472_v3 = vadd.f32 %v896_v52, %v4327_v34  ;;  %3973 = vpow2.f32 %v3215_v63  ;;  %v892_v36 = vadd.f32 %v4445_v33, %v882_v0  ;;  %v4191_v33 = vmov 0.0  }
 0x343   :  { %3975 = vrcp.f32 %v719_v1  ;;  %v4476_v4 = vadd.f32 %v897_v2, %v4333_v39  ;;  %3535 = vmatprep.subr.bf16.mxu1 %v4191_v33  ;;  %3587 = vmatprep.subr.bf16.mxu0 %v4191_v33 }
 0x344   :  { %v898_v5 = vmax.f32 %v892_v36, 0.0  ;;  %3568 = vmatmul.mubr.msk.f32.gmra.mrb[20].mxu0 %vm310_vm4, %v4472_v3  ;;  %3541 = vmatprep.mubr.msk.bf16.mxu1 %vm4192_vm6, %v4191_v33 }
 0x345   :  { %v3966_v26 = vpop.eup %3965  ;;  %3570 = vmatprep.mubr.msk.f32.mxu0 %vm310_vm4, %v4476_v4  ;;  %v741_v45 = vpop.permute.xlu1 %740 }
 0x346   :  { %v720_v51 = vadd.f32 1.0, %v3966_v26  ;;  %v4483_v59 = vadd.f32 %v898_v5, %v4337_v40 }
 0x348   :  { %v3968_v34 = vpop.eup %3967  ;;  %3571 = vmatmul.mubr.msk.f32.gmra.mrb[22].mxu0 %vm310_vm4, %v4483_v59  ;;  %3977 = vrcp.f32 %v720_v51 }
 0x349   :  { %v721_v39 = vadd.f32 1.0, %v3968_v34  ;;  %v3970_v7 = vpop.eup %3969  ;;  %3593 = vmatprep.mubr.msk.bf16.mxu0 %vm4192_vm6, %v4191_v33 }
 0x34a   :  { %v3972_v8 = vpop.eup %3971  ;;  %v722_v10 = vadd.f32 1.0, %v3970_v7 }
 0x34b   :  { %3979 = vrcp.f32 %v721_v39 }
 0x34c   :  { %v3974_v12 = vpop.eup %3973  ;;  %3981 = vrcp.f32 %v722_v10 }
 0x34d   :  { %v3976_v13 = vpop.eup %3975  ;;  %v723_v58 = vadd.f32 1.0, %v3974_v12  ;;  %v4511_v12 = vld [vmem:[%s5037_s3] sm:$0xff]  }
 0x34e   :  { %v3894_v40 = vpack.i.bf16 %v3976_v13, %v3972_v8  ;;  %v755_v18 = vmul.f32 %v3976_v13, %v739_v20 }
 0x34f   :  { %3983 = vrcp.f32 %v723_v58 }
 0x350   :  { %3895 = vrot.lane.b32.xlu0 %v3894_v40, %s4189_s14 }
 0x352   :  { %v3978_v14 = vpop.eup %3977 }
 0x353   :  { %v756_v62 = vmul.f32 %v3978_v14, %v741_v45 }
 0x354   :  { %744 = vrot.lane.b32.xlu0 %v4412_v9, %s4190_s0  ;;  %v737_v9 = vpop.permute.xlu0 %736 }
 0x355   :  { %v3980_v15 = vpop.eup %3979  ;;  %v754_v60 = vmul.f32 %v3972_v8, %v737_v9 }
 0x356   :  { %v3899_v61 = vpack.i.bf16 %v3980_v15, %v3978_v14  ;;  %v3982_v31 = vpop.eup %3981 }
 0x358   :  { %3900 = vrot.lane.b32.xlu1 %v3899_v61, %s4189_s14  ;;  %v743_v24 = vpop.permute.xlu0 %742 }
 0x359   :  { %v3984_v21 = vpop.eup %3983  ;;  %v757_v50 = vmul.f32 %v3980_v15, %v743_v24 }
 0x35a   :  { %v3904_v23 = vpack.i.bf16 %v3984_v21, %v3982_v31 }
 0x35c   :  { %746 = vrot.lane.b32.xlu1 %v4414_v11, %s4190_s0  ;;  %3905 = vrot.lane.b32.xlu0 %v3904_v23, %s4189_s14 }
 0x3c2   :  { %v3896_v28 = vpop.permute.xlu0 %3895 }
 0x3c3   :  { %v3898_v30 = vunpack.i.h.bf16 %v3896_v28  ;;  %v3897_v35 = vunpack.i.l.bf16 %v3896_v28  ;;  %v908_v28 = vld [vmem:[#allocation2 + $0x40] sm:$0xff] }
 0x3c5   :  { %v784_v37 = vsel %vm310_vm4, %v754_v60, %v3897_v35  ;;  %v785_v38 = vsel %vm310_vm4, %v755_v18, %v3898_v30  ;;  %v909_v60 = vld [vmem:[#allocation2 + $0x48] sm:$0xff]  ;;  %v910_v30 = vld [vmem:[#allocation2 + $0x50] sm:$0xff]  ;;  %v911_v35 = vld [vmem:[#allocation2 + $0x58] sm:$0xff] }
 0x3c6   :  { %v790_v29 = vpack.c.bf16 %v785_v38, %v784_v37  ;;  %v745_v11 = vpop.permute.xlu0 %744  ;;  %v3797_v18 = vpack.c.bf16 %v909_v60, %v908_v28  ;;  %v3801_v37 = vpack.c.bf16 %v911_v35, %v910_v30 }
 0x3c7   :  { %v758_v26 = vmul.f32 %v3982_v31, %v745_v11  ;;  %v4533_v11 = vsub.s32 3, %v4344_v42 }
 0x3c8   :  { %3536 = vmatpush3.bf16.msra.mxu1 %v790_v29  ;;  %v4530_v29 = vsub.s32 2, %v4344_v42 }
 0x3c9   :  { %3537 = vmatprep.subr.bf16.mxu1 %v4191_v33 }
 0x3ca   :  { %v3901_v46 = vpop.permute.xlu1 %3900 }
 0x3cb   :  { %v3903_v52 = vunpack.i.h.bf16 %v3901_v46  ;;  %v3902_v63 = vunpack.i.l.bf16 %v3901_v46 }
 0x3cd   :  { %v787_v0 = vsel %vm310_vm4, %v757_v50, %v3903_v52  ;;  %v786_v1 = vsel %vm310_vm4, %v756_v62, %v3902_v63  ;;  %v862_v50 = vrot.slane %v4352_v44, %v4530_v29  ;;  %v868_v63 = vrot.slane %v4352_v44, %v4533_v11  ;;  %v4556_v44 = vld [vmem:[%s5039_s5 + $0x8] sm:$0xff] }
 0x3ce   :  { %v791_v2 = vpack.c.bf16 %v787_v0, %v786_v1  ;;  %v3906_v36 = vpop.permute.xlu0 %3905  ;;  %v747_v5 = vpop.permute.xlu1 %746  ;;  %v1006_v60 = vrot.slane %v4556_v44, %v4430_v16 }
 0x3cf   :  { %v3908_v51 = vunpack.i.h.bf16 %v3906_v36  ;;  %v3907_v34 = vunpack.i.l.bf16 %v3906_v36  ;;  %v759_v39 = vmul.f32 %v3984_v21, %v747_v5 }
 0x3d0   :  { %3538 = vmatpush3.bf16.msra.mxu1 %v791_v2 }
 0x3d1   :  { %v788_v7 = vsel %vm310_vm4, %v758_v26, %v3907_v34  ;;  %v789_v8 = vsel %vm310_vm4, %v759_v39, %v3908_v51  ;;  %3539 = vmatprep.subr.bf16.mxu1 %v4191_v33 }
 0x3d2   :  { %v792_v10 = vpack.c.bf16 %v789_v8, %v788_v7 }
 0x3d4   :  { %3540 = vmatpush3.bf16.msra.mxu1 %v792_v10 }
 0x3d5   :  { %3798 = vmatprep.subr.bf16.mxu1 %v3797_v18 }
 0x3d7   :  { %3542 = vmatmul.mubr.msk.bf16.vlgmr.msra.gmra.mrb[12].mxu1 %vm798_vm7, %v4511_v12 }
 0x3d8   :  { %3800 = vmatpush3.bf16.msra.mxu1 %v3797_v18 }
 0x3d9   :  { %3802 = vmatprep.subr.bf16.mxu1 %v3801_v37 }
 0x3dc   :  { %3804 = vmatpush3.bf16.msra.mxu1 %v3801_v37 }
 0x40f   :  { %v4515_v13 = vpop.f32.mrb[6].mxu0 }
 0x410   :  { %v4517_v58 = vpop.f32.mrb[7].mxu0 }
 0x411   :  { %v1092_v35 = vadd.f32 %v4517_v58, %v1006_v60 }
 0x417   :  { %v4519_v40 = vpop.f32.mrb[20].mxu0 }
 0x418   :  { %v4521_v14 = vpop.f32.mrb[21].mxu0 }
 0x41b   :  { %v4523_v15 = vpop.f32.mrb[22].mxu0 }
 0x41c   :  { %v4525_v61 = vpop.f32.mrb[23].mxu0 }
 0x4aa   :  { %v836_v31 = vpop.f32.mrb[12].mxu1 }
 0x4ab   :  { %v843_v21 = vadd.f32 1e-06, %v836_v31  ;;  %v3543_v23 = vpop.f32.mrb[13].mxu1 }
 0x4ac   :  { %v839_v9 = vpop.f32.mrb[14].mxu1 }
 0x4ad   :  { %3985 = vrcp.f32 %v843_v21  ;;  %v844_v24 = vadd.f32 1e-06, %v839_v9  ;;  %v3544_v20 = vpop.f32.mrb[15].mxu1 }
 0x4af   :  { %3987 = vrcp.f32 %v844_v24 }
 0x4b7   :  { %v3986_v38 = vpop.eup %3985 }
 0x4b8   :  { %849 = vrot.lane.b32.xlu1 %v3986_v38, %s4190_s0  ;;  %v1097_v38 = vadd.f32 %v4515_v13, %v1006_v60  ;;  %v1107_v13 = vadd.f32 %v4519_v40, %v1006_v60 }
 0x4b9   :  { %v3988_v45 = vpop.eup %3987 }
 0x4ba   :  { %851 = vrot.lane.b32.xlu0 %v3988_v45, %s4190_s0 }
 0x52a   :  { %v850_v46 = vpop.permute.xlu1 %849 }
 0x52b   :  { %v855_v62 = vmul.f32 %v850_v46, %v836_v31 }
 0x52c   :  { %v852_v52 = vpop.permute.xlu0 %851 }
 0x52d   :  { %v857_v0 = vadd.f32 %v855_v62, %v4358_v49  ;;  %v856_v1 = vmul.f32 %v852_v52, %v839_v9 }
 0x52f   :  { %v863_v2 = vmul.f32 %v862_v50, %v857_v0  ;;  %v858_v36 = vadd.f32 %v856_v1, %v4356_v47 }
 0x531   :  { %v869_v5 = vadd.f32 %v868_v63, %v863_v2  ;;  %v864_v26 = vmul.f32 %v862_v50, %v858_v36  ;;  %v1102_v36 = vadd.f32 %v4521_v14, %v1006_v60 }
 0x533   :  { %v871_v51 = vmax.f32 %v869_v5, 0.0  ;;  %v870_v42 = vadd.f32 %v868_v63, %v864_v26 }
 0x535   :  { %v872_v34 = vmax.f32 %v870_v42, 0.0  ;;  %v4542_v39 = vadd.f32 %v871_v51, %v4304_v25  ;;  %v921_v25 = vrot.slane %v4556_v44, %v4347_v43 }
 0x537   :  { %v4545_v7 = vadd.f32 %v872_v34, %v4306_v27  ;;  %3553 = vmatprep.mubr.msk.f32.mxu1 %vm310_vm4, %v4542_v39  ;;  %v1112_v34 = vadd.f32 %v4525_v61, %v1006_v60 }
 0x539   :  { %3554 = vmatmul.mubr.msk.f32.vlgmr.msra.gmra.mrb[10].mxu1 %vm310_vm4, %v4545_v7 }
 0x53a   :  { %3575 = vmatprep.mubr.msk.bf16.mxu1 %vm540_vm5, %v4323_v32 }
 0x60c   :  { %v3555_v47 = vpop.f32.mrb[10].mxu1 }
 0x60d   :  { %v4560_v27 = vadd.f32 %v3555_v47, %v921_v25  ;;  %v994_v49 = vpop.f32.mrb[11].mxu1 }
 0x60e   :  { %v4562_v8 = vadd.f32 %v994_v49, %v921_v25 }
 0x610   :  { %v1120_v10 = vpack.c.bf16 %v4560_v27, %v4562_v8 }
 0x612   :  { %3573 = vmatprep.subr.bf16.mxu1 %v1120_v10 }
 0x613   :  { %3574 = vmatpush3.bf16.msra.mxu1 %v1120_v10  ;;  %v1117_v10 = vadd.f32 %v4523_v15, %v1006_v60 }
 0x616   :  { %3576 = vmatmul.mubr.msk.bf16.vlgmr.msra.gmra.mrb[16].mxu1 %vm540_vm5, %v4369_v53 }
 0x617   :  { %3579 = vmatprep.mubr.msk.bf16.mxu1 %vm540_vm5, %v4374_v54 }
 0x61e   :  { %3580 = vmatmul.mubr.msk.bf16.gmra.mrb[20].mxu1 %vm540_vm5, %v4383_v55 }
 0x61f   :  { %3583 = vmatprep.mubr.msk.bf16.mxu1 %vm540_vm5, %v4388_v56 }
 0x626   :  { %3584 = vmatmul.mubr.msk.bf16.gmra.mrb[24].mxu1 %vm540_vm5, %v4397_v57 }
 0x6e9   :  { %v3577_v32 = vpop.f32.mrb[16].mxu1 }
 0x6ea   :  { %1212 = vrot.lane.b32.xlu1 %v3577_v32, %s4188_s13  ;;  %v1155_v31 = vpop.f32.mrb[17].mxu1 }
 0x6eb   :  { %v3578_v21 = vpop.f32.mrb[18].mxu1 }
 0x6ec   :  { %1214 = vrot.lane.b32.xlu0 %v3578_v21, %s4188_s13  ;;  %v1158_v53 = vpop.f32.mrb[19].mxu1 }
 0x6ee   :  { %1208 = vrot.lane.b32.xlu1 %v1155_v31, %s4188_s13 }
 0x6f0   :  { %1210 = vrot.lane.b32.xlu0 %v1158_v53, %s4188_s13 }
 0x6f1   :  { %v3581_v54 = vpop.f32.mrb[20].mxu1 }
 0x6f2   :  { %1238 = vrot.lane.b32.xlu1 %v3581_v54, %s4189_s14  ;;  %v4581_v55 = vpop.f32.mrb[21].mxu1 }
 0x6f3   :  { %v3582_v56 = vpop.f32.mrb[22].mxu1 }
 0x6f4   :  { %1240 = vrot.lane.b32.xlu0 %v3582_v56, %s4189_s14  ;;  %v4584_v57 = vpop.f32.mrb[23].mxu1 }
 0x6f6   :  { %1216 = vrot.lane.b32.xlu1 %v4581_v55, %s4188_s13 }
 0x6f8   :  { %1218 = vrot.lane.b32.xlu0 %v4584_v57, %s4188_s13 }
 0x6f9   :  { %v3585_v23 = vpop.f32.mrb[24].mxu1 }
 0x6fa   :  { %v1187_v9 = vpop.f32.mrb[25].mxu1 }
 0x6fb   :  { %1242 = vrot.lane.b32.xlu1 %v1187_v9, %s4189_s14  ;;  %v3586_v24 = vpop.f32.mrb[26].mxu1 }
 0x6fc   :  { %v1190_v20 = vpop.f32.mrb[27].mxu1 }
 0x6fd   :  { %1244 = vrot.lane.b32.xlu0 %v1190_v20, %s4189_s14 }
 0x6ff   :  { %1246 = vrot.lane.b32.xlu1 %v3585_v23, %s4189_s14 }
 0x701   :  { %1248 = vrot.lane.b32.xlu0 %v3586_v24, %s4189_s14 }
 0x703   :  { %1298 = vrot.lane.b32.xlu1 %v1155_v31, %s4190_s0 }
 0x705   :  { %1300 = vrot.lane.b32.xlu0 %v1158_v53, %s4190_s0 }
 0x707   :  { %1304 = vrot.lane.b32.xlu1 %v3578_v21, %s4190_s0 }
 0x709   :  { %1302 = vrot.lane.b32.xlu0 %v3577_v32, %s4190_s0 }
 0x75c   :  { %v1213_v28 = vpop.permute.xlu1 %1212 }
 0x75d   :  { %v1228_v5 = vadd.f32 %v1213_v28, %v1102_v36 }
 0x75e   :  { %v1215_v18 = vpop.permute.xlu0 %1214 }
 0x75f   :  { %v1229_v51 = vadd.f32 %v1215_v18, %v1107_v13 }
 0x760   :  { %v1209_v30 = vpop.permute.xlu1 %1208 }
 0x761   :  { %v1226_v45 = vadd.f32 %v1209_v30, %v1092_v35 }
 0x762   :  { %v1211_v37 = vpop.permute.xlu0 %1210 }
 0x763   :  { %v1227_v50 = vadd.f32 %v1211_v37, %v1097_v38 }
 0x764   :  { %v1239_v46 = vpop.permute.xlu1 %1238 }
 0x765   :  { %v4602_v62 = vadd.f32 %v1239_v46, %v1226_v45 }
 0x766   :  { %v1241_v52 = vpop.permute.xlu0 %1240 }
 0x767   :  { %v3233_v63 = vmul.f32 -1.442695, %v4602_v62  ;;  %v4605_v0 = vadd.f32 %v1241_v52, %v1227_v50 }
 0x768   :  { %v1217_v1 = vpop.permute.xlu1 %1216 }
 0x769   :  { %3989 = vpow2.f32 %v3233_v63  ;;  %v3234_v2 = vmul.f32 -1.442695, %v4605_v0  ;;  %v1230_v32 = vadd.f32 %v1217_v1, %v1112_v34 }
 0x76a   :  { %v1219_v58 = vpop.permute.xlu0 %1218 }
 0x76b   :  { %3991 = vpow2.f32 %v3234_v2  ;;  %v1231_v21 = vadd.f32 %v1219_v58, %v1117_v10 }
 0x76d   :  { %v1243_v26 = vpop.permute.xlu1 %1242 }
 0x76e   :  { %v4610_v42 = vadd.f32 %v1243_v26, %v1228_v5 }
 0x76f   :  { %v1245_v25 = vpop.permute.xlu0 %1244 }
 0x770   :  { %v3235_v47 = vmul.f32 -1.442695, %v4610_v42  ;;  %v4614_v49 = vadd.f32 %v1245_v25, %v1229_v51 }
 0x771   :  { %v1247_v14 = vpop.permute.xlu1 %1246 }
 0x772   :  { %3993 = vpow2.f32 %v3235_v47  ;;  %v3236_v31 = vmul.f32 -1.442695, %v4614_v49  ;;  %v4618_v53 = vadd.f32 %v1247_v14, %v1230_v32 }
 0x773   :  { %v3990_v40 = vpop.eup %3989  ;;  %v1249_v54 = vpop.permute.xlu0 %1248 }
 0x774   :  { %v1280_v56 = vadd.f32 1.0, %v3990_v40  ;;  %3995 = vpow2.f32 %v3236_v31  ;;  %v3237_v23 = vmul.f32 -1.442695, %v4618_v53  ;;  %v4621_v9 = vadd.f32 %v1249_v54, %v1231_v21 }
 0x775   :  { %v3992_v61 = vpop.eup %3991  ;;  %v1299_v13 = vpop.permute.xlu1 %1298 }
 0x776   :  { %3997 = vrcp.f32 %v1280_v56  ;;  %v1281_v24 = vadd.f32 1.0, %v3992_v61  ;;  %v3238_v15 = vmul.f32 -1.442695, %v4621_v9 }
 0x777   :  { %3999 = vpow2.f32 %v3237_v23  ;;  %v1301_v26 = vpop.permute.xlu0 %1300 }
 0x778   :  { %4001 = vrcp.f32 %v1281_v24 }
 0x779   :  { %4003 = vpow2.f32 %v3238_v15  ;;  %v1305_v5 = vpop.permute.xlu1 %1304 }
 0x77b   :  { %v1303_v31 = vpop.permute.xlu0 %1302 }
 0x77c   :  { %v3994_v20 = vpop.eup %3993 }
 0x77d   :  { %v1282_v28 = vadd.f32 1.0, %v3994_v20 }
 0x77e   :  { %v3996_v60 = vpop.eup %3995 }
 0x77f   :  { %v1283_v18 = vadd.f32 1.0, %v3996_v60  ;;  %4005 = vrcp.f32 %v1282_v28 }
 0x780   :  { %v3998_v30 = vpop.eup %3997 }
 0x781   :  { %v4000_v35 = vpop.eup %3999  ;;  %4007 = vrcp.f32 %v1283_v18  ;;  %v1316_v34 = vmul.f32 %v3998_v30, %v1299_v13 }
 0x782   :  { %v4002_v37 = vpop.eup %4001  ;;  %v1284_v38 = vadd.f32 1.0, %v4000_v35 }
 0x783   :  { %v4004_v45 = vpop.eup %4003  ;;  %v3909_v46 = vpack.i.bf16 %v4002_v37, %v3998_v30  ;;  %v1317_v25 = vmul.f32 %v4002_v37, %v1301_v26  ;;  %v1461_v26 = vld [vmem:[#allocation5 + $0x28] sm:$0xff] }
 0x784   :  { %v1285_v50 = vadd.f32 1.0, %v4004_v45  ;;  %4009 = vrcp.f32 %v1284_v38 }
 0x785   :  { %3910 = vrot.lane.b32.xlu1 %v3909_v46, %s4189_s14  ;;  %v1578_v46 = vld [vmem:[#allocation2 + $0x80] sm:$0xff] }
 0x786   :  { %4011 = vrcp.f32 %v1285_v50  ;;  %v1579_v50 = vld [vmem:[#allocation2 + $0x88] sm:$0xff] }
 0x789   :  { %1306 = vrot.lane.b32.xlu1 %v4581_v55, %s4190_s0  ;;  %v4006_v52 = vpop.eup %4005 }
 0x78a   :  { %v1318_v21 = vmul.f32 %v4006_v52, %v1303_v31  ;;  %v1583_v31 = vld [vmem:[#allocation2 + $0xa8] sm:$0xff] }
 0x78b   :  { %v4008_v63 = vpop.eup %4007 }
 0x78c   :  { %v3914_v1 = vpack.i.bf16 %v4008_v63, %v4006_v52  ;;  %v1319_v40 = vmul.f32 %v4008_v63, %v1305_v5  ;;  %v3821_v52 = vpack.c.bf16 %v1579_v50, %v1578_v46  ;;  %v1460_v5 = vld [vmem:[#allocation5 + $0x20] sm:$0xff] }
 0x78e   :  { %3915 = vrot.lane.b32.xlu0 %v3914_v1, %s4189_s14  ;;  %v4010_v2 = vpop.eup %4009  ;;  %3822 = vmatprep.subr.bf16.mxu1 %v3821_v52 }
 0x78f   :  { %3824 = vmatpush3.bf16.msra.mxu1 %v3821_v52 }
 0x790   :  { %v4012_v36 = vpop.eup %4011 }
 0x791   :  { %v3919_v58 = vpack.i.bf16 %v4012_v36, %v4010_v2 }
 0x792   :  { %1308 = vrot.lane.b32.xlu0 %v4584_v57, %s4190_s0 }
 0x793   :  { %3920 = vrot.lane.b32.xlu1 %v3919_v58, %s4189_s14 }
 0x7f7   :  { %v3911_v51 = vpop.permute.xlu1 %3910 }
 0x7f8   :  { %v3913_v55 = vunpack.i.h.bf16 %v3911_v51  ;;  %v3912_v47 = vunpack.i.l.bf16 %v3911_v51  ;;  %v3813_v51 = vpack.c.bf16 %v1461_v26, %v1460_v5 }
 0x7fa   :  { %v1347_v10 = vsel %vm310_vm4, %v1317_v25, %v3913_v55  ;;  %v1346_v32 = vsel %vm310_vm4, %v1316_v34, %v3912_v47  ;;  %v1462_v34 = vld [vmem:[#allocation5 + $0x30] sm:$0xff]  ;;  %v1463_v25 = vld [vmem:[#allocation5 + $0x38] sm:$0xff] }
 0x7fb   :  { %v1352_v14 = vpack.c.bf16 %v1347_v10, %v1346_v32  ;;  %v1307_v54 = vpop.permute.xlu1 %1306  ;;  %v1580_v55 = vld [vmem:[#allocation2 + $0x90] sm:$0xff]  ;;  %v1581_v47 = vld [vmem:[#allocation2 + $0x98] sm:$0xff]  ;;  %v3817_v10 = vpack.c.bf16 %v1463_v25, %v1462_v34 }
 0x7fc   :  { %v1320_v18 = vmul.f32 %v4010_v2, %v1307_v54  ;;  %v3825_v32 = vpack.c.bf16 %v1581_v47, %v1580_v55  ;;  %v1429_v54 = vrot.slane %v4556_v44, %v4435_v19 }
 0x7fd   :  { %3588 = vmatpush3.bf16.msra.mxu0 %v1352_v14  ;;  %v1582_v14 = vld [vmem:[#allocation2 + $0xa0] sm:$0xff] }
 0x7fe   :  { %3589 = vmatprep.subr.bf16.mxu0 %v4191_v33  ;;  %3826 = vmatprep.subr.bf16.mxu1 %v3825_v32  ;;  %v1431_v46 = vmul.f32 %v1429_v54, %v4605_v0  ;;  %v1435_v5 = vmul.f32 %v1429_v54, %v4621_v9 }
 0x7ff   :  { %3828 = vmatpush3.bf16.msra.mxu1 %v3825_v32 }
 0x800   :  { %v3916_v57 = vpop.permute.xlu0 %3915 }
 0x801   :  { %v3918_v56 = vunpack.i.h.bf16 %v3916_v57  ;;  %v3917_v61 = vunpack.i.l.bf16 %v3916_v57  ;;  %v3829_v57 = vpack.c.bf16 %v1583_v31, %v1582_v14 }
 0x803   :  { %v1349_v23 = vsel %vm310_vm4, %v1319_v40, %v3918_v56  ;;  %v1348_v24 = vsel %vm310_vm4, %v1318_v21, %v3917_v61  ;;  %v1415_v61 = vrot.slane %v4556_v44, %v4530_v29 }
 0x804   :  { %v1353_v15 = vpack.c.bf16 %v1349_v23, %v1348_v24  ;;  %v1309_v20 = vpop.permute.xlu0 %1308  ;;  %v1439_v24 = vrot.slane %v4556_v44, %v4438_v22 }
 0x805   :  { %v1321_v28 = vmul.f32 %v4012_v36, %v1309_v20  ;;  %v3921_v60 = vpop.permute.xlu1 %3920 }
 0x806   :  { %v3923_v30 = vunpack.i.h.bf16 %v3921_v60  ;;  %v3922_v35 = vunpack.i.l.bf16 %v3921_v60  ;;  %3590 = vmatpush3.bf16.msra.mxu0 %v1353_v15  ;;  %v1430_v15 = vmul.f32 %v1429_v54, %v4602_v62  ;;  %v1432_v62 = vmul.f32 %v1429_v54, %v4610_v42 }
 0x807   :  { %3591 = vmatprep.subr.bf16.mxu0 %v4191_v33  ;;  %v1445_v25 = vadd.f32 %v1439_v24, %v1435_v5 }
 0x808   :  { %v1351_v37 = vsel %vm310_vm4, %v1321_v28, %v3923_v30  ;;  %v1350_v38 = vsel %vm310_vm4, %v1320_v18, %v3922_v35  ;;  %v1421_v28 = vrot.slane %v4556_v44, %v4533_v11 }
 0x809   :  { %v1354_v45 = vpack.c.bf16 %v1351_v37, %v1350_v38  ;;  %v1440_v37 = vadd.f32 %v1439_v24, %v1430_v15 }
 0x80b   :  { %3592 = vmatpush3.bf16.msra.mxu0 %v1354_v45 }
 0x80c   :  { %3814 = vmatprep.subr.bf16.mxu0 %v3813_v51 }
 0x80e   :  { %3594 = vmatmul.mubr.msk.bf16.vlgmr.msra.gmra.mrb[24].mxu0 %vm798_vm7, %v4511_v12 }
 0x80f   :  { %3816 = vmatpush3.bf16.msra.mxu0 %v3813_v51 }
 0x810   :  { %3818 = vmatprep.subr.bf16.mxu0 %v3817_v10 }
 0x813   :  { %3820 = vmatpush3.bf16.msra.mxu0 %v3817_v10  ;;  %v1451_v10 = vmax.f32 %v1445_v25, 0.0 }
 0x814   :  { %3830 = vmatprep.subr.bf16.mxu0 %v3829_v57 }
 0x8e1   :  { %v1389_v63 = vpop.f32.mrb[24].mxu0 }
 0x8e2   :  { %v1396_v1 = vadd.f32 1e-06, %v1389_v63  ;;  %v3595_v2 = vpop.f32.mrb[25].mxu0 }
 0x8e3   :  { %v1392_v36 = vpop.f32.mrb[26].mxu0  ;;  %v1585_v2 = vld [vmem:[#allocation2 + $0xb8] sm:$0xff] }
 0x8e4   :  { %4013 = vrcp.f32 %v1396_v1  ;;  %v1397_v58 = vadd.f32 1e-06, %v1392_v36  ;;  %v3596_v13 = vpop.f32.mrb[27].mxu0  ;;  %v1584_v1 = vld [vmem:[#allocation2 + $0xb0] sm:$0xff] }
 0x8e5   :  { %v3833_v0 = vpack.c.bf16 %v1585_v2, %v1584_v1  ;;  %v1442_v13 = vadd.f32 %v1439_v24, %v1432_v62 }
 0x8e6   :  { %4015 = vrcp.f32 %v1397_v58 }
 0x8ee   :  { %v4014_v40 = vpop.eup %4013 }
 0x8ef   :  { %1402 = vrot.lane.b32.xlu0 %v4014_v40, %s4190_s0 }
 0x8f0   :  { %v4016_v21 = vpop.eup %4015 }
 0x8f1   :  { %1404 = vrot.lane.b32.xlu1 %v4016_v21, %s4190_s0 }
 0x961   :  { %v1403_v56 = vpop.permute.xlu0 %1402 }
 0x962   :  { %v1408_v23 = vmul.f32 %v1403_v56, %v1389_v63  ;;  %v1446_v63 = vmax.f32 %v1440_v37, 0.0  ;;  %v2130_v37 = vld [vmem:[#allocation2 + $0xe8] sm:$0xff] }
 0x963   :  { %v1405_v20 = vpop.permute.xlu1 %1404 }
 0x964   :  { %v1410_v60 = vadd.f32 %v1408_v23, %v4562_v8  ;;  %v1409_v18 = vmul.f32 %v1405_v20, %v1392_v36  ;;  %v1441_v8 = vadd.f32 %v1439_v24, %v1431_v46  ;;  %v1433_v36 = vmul.f32 %v1429_v54, %v4614_v49  ;;  %v4740_v23 = vld [vmem:[%s5036_s2 + $0x10] sm:$0xff]  }
 0x965   :  { %v4668_v42 = vadd.f32 %v1446_v63, %v4452_v6  ;;  %v4681_v6 = vld [vmem:[%s5036_s2] sm:$0xff]   ;;  %v2132_v63 = vld [vmem:[#allocation2 + $0xf8] sm:$0xff] }
 0x966   :  { %v1416_v30 = vmul.f32 %v1415_v61, %v1410_v60  ;;  %v1411_v35 = vadd.f32 %v1409_v18, %v4560_v27  ;;  %v1443_v49 = vadd.f32 %v1439_v24, %v1433_v36  ;;  %v4755_v60 = vld [vmem:[%s5036_s2 + $0x18] sm:$0xff]   ;;  %v4762_v18 = vld [vmem:[%s5036_s2 + $0x20] sm:$0xff]  }
 0x968   :  { %v1422_v38 = vadd.f32 %v1421_v28, %v1416_v30  ;;  %v1417_v45 = vmul.f32 %v1415_v61, %v1411_v35  ;;  %v1449_v34 = vmax.f32 %v1443_v49, 0.0  ;;  %v4733_v61 = vld [vmem:[%s5036_s2 + $0x8] sm:$0xff]   ;;  %v2129_v35 = vld [vmem:[#allocation2 + $0xe0] sm:$0xff] }
 0x969   :  { %v4769_v30 = vld [vmem:[%s5036_s2 + $0x28] sm:$0xff]  }
 0x96a   :  { %v1424_v50 = vmax.f32 %v1422_v38, 0.0  ;;  %v1423_v52 = vadd.f32 %v1421_v28, %v1417_v45  ;;  %v4697_v47 = vadd.f32 %v1449_v34, %v4472_v3  ;;  %v4716_v3 = vld [vmem:[%s5039_s5 + $0x10] sm:$0xff]  ;;  %v3845_v38 = vpack.c.bf16 %v2130_v37, %v2129_v35 }
 0x96b   :  { %v1670_v5 = vrot.slane %v4716_v3, %v4430_v16 }
 0x96c   :  { %v1425_v58 = vmax.f32 %v1423_v52, 0.0  ;;  %v4657_v44 = vadd.f32 %v1424_v50, %v4542_v39  ;;  %v1434_v39 = vmul.f32 %v1429_v54, %v4618_v53  ;;  %v1448_v53 = vmax.f32 %v1442_v13, 0.0  ;;  %v2131_v52 = vld [vmem:[#allocation2 + $0xf0] sm:$0xff] }
 0x96d   :  { %v3849_v1 = vpack.c.bf16 %v2132_v63, %v2131_v52 }
 0x96e   :  { %v4661_v27 = vadd.f32 %v1425_v58, %v4545_v7  ;;  %3605 = vmatprep.mubr.msk.f32.mxu0 %vm310_vm4, %v4657_v44  ;;  %3616 = vmatprep.mubr.msk.f32.mxu1 %vm310_vm4, %v4657_v44  ;;  %v1447_v7 = vmax.f32 %v1441_v8, 0.0  ;;  %v1444_v26 = vadd.f32 %v1439_v24, %v1434_v39  ;;  %v4690_v9 = vadd.f32 %v1448_v53, %v4466_v48 }
 0x96f   :  { %v4707_v48 = vadd.f32 %v1451_v10, %v4483_v59 }
 0x970   :  { %3606 = vmatmul.mubr.msk.f32.vlgmr.msra.gmra.mrb[28].mxu0 %vm310_vm4, %v4661_v27  ;;  %3617 = vmatmul.mubr.msk.f32.vlgmr.msra.gmra.mrb[28].mxu1 %vm310_vm4, %v4661_v27  ;;  %v4686_v51 = vadd.f32 %v1447_v7, %v4459_v17  ;;  %v1450_v55 = vmax.f32 %v1444_v26, 0.0 }
 0x971   :  { %3832 = vmatpush3.bf16.msra.mxu0 %v3829_v57  ;;  %3627 = vmatprep.mubr.msk.f32.mxu0 %vm310_vm4, %v4668_v42 }
 0x972   :  { %3834 = vmatprep.subr.bf16.mxu0 %v3833_v0  ;;  %3638 = vmatprep.mubr.msk.bf16.mxu1 %vm540_vm5, %v4681_v6  ;;  %v4700_v17 = vadd.f32 %v1450_v55, %v4476_v4  ;;  %v1591_v4 = vrot.slane %v4716_v3, %v4347_v43 }
 0x975   :  { %3836 = vmatpush3.bf16.msra.mxu0 %v3833_v0 }
 0x976   :  { %3650 = vmatprep.subr.bf16.mxu0 %v4191_v33 }
 0x978   :  { %3628 = vmatmul.mubr.msk.f32.vlgmr.msra.gmra.mrb[30].mxu0 %vm310_vm4, %v4686_v51 }
 0x979   :  { %3630 = vmatprep.mubr.msk.f32.mxu0 %vm310_vm4, %v4690_v9 }
 0x97c   :  { %3631 = vmatmul.mubr.msk.f32.gmra.mrb[32].mxu0 %vm310_vm4, %v4697_v47 }
 0x97d   :  { %3633 = vmatprep.mubr.msk.f32.mxu0 %vm310_vm4, %v4700_v17 }
 0x980   :  { %3634 = vmatmul.mubr.msk.f32.gmra.mrb[34].mxu0 %vm310_vm4, %v4707_v48 }
 0x981   :  { %3656 = vmatprep.mubr.msk.bf16.mxu0 %vm4192_vm6, %v4191_v33 }
 0xa43   :  { %v4720_v32 = vpop.f32.mrb[28].mxu0  ;;  %v3618_v14 = vpop.f32.mrb[28].mxu1 }
 0xa44   :  { %v4722_v31 = vadd.f32 %v3618_v14, %v1591_v4  ;;  %v4724_v59 = vpop.f32.mrb[29].mxu0  ;;  %v1658_v57 = vpop.f32.mrb[29].mxu1 }
 0xa45   :  { %v4726_v40 = vadd.f32 %v1658_v57, %v1591_v4  ;;  %v2093_v4 = vrot.slane %v4716_v3, %v4435_v19  ;;  %v4802_v57 = vrot.slane %v4716_v3, %v4438_v22 }
 0xa47   :  { %v1784_v21 = vpack.c.bf16 %v4722_v31, %v4726_v40 }
 0xa49   :  { %3636 = vmatprep.subr.bf16.mxu1 %v1784_v21 }
 0xa4a   :  { %3637 = vmatpush3.bf16.msra.mxu1 %v1784_v21 }
 0xa4b   :  { %v3629_v54 = vpop.f32.mrb[30].mxu0  ;;  %3846 = vmatprep.subr.bf16.mxu1 %v3845_v38 }
 0xa4c   :  { %v1755_v56 = vpop.f32.mrb[31].mxu0  ;;  %v1761_v55 = vadd.f32 %v3629_v54, %v1670_v5 }
 0xa4d   :  { %3639 = vmatmul.mubr.msk.bf16.vlgmr.msra.gmra.mrb[32].mxu1 %vm540_vm5, %v4733_v61  ;;  %v1756_v34 = vadd.f32 %v1755_v56, %v1670_v5 }
 0xa4e   :  { %3642 = vmatprep.mubr.msk.bf16.mxu1 %vm540_vm5, %v4740_v23  ;;  %3848 = vmatpush3.bf16.msra.mxu1 %v3845_v38 }
 0xa4f   :  { %v4744_v24 = vpop.f32.mrb[32].mxu0  ;;  %3850 = vmatprep.subr.bf16.mxu1 %v3849_v1 }
 0xa50   :  { %v4746_v15 = vpop.f32.mrb[33].mxu0 }
 0xa51   :  { %v1766_v63 = vadd.f32 %v4746_v15, %v1670_v5 }
 0xa52   :  { %3852 = vmatpush3.bf16.msra.mxu1 %v3849_v1  ;;  %v1771_v1 = vadd.f32 %v4744_v24, %v1670_v5 }
 0xa53   :  { %v4748_v20 = vpop.f32.mrb[34].mxu0  ;;  %3702 = vmatprep.subr.bf16.mxu1 %v4191_v33 }
 0xa54   :  { %v4750_v28 = vpop.f32.mrb[35].mxu0 }
 0xa55   :  { %3643 = vmatmul.mubr.msk.bf16.gmra.mrb[36].mxu1 %vm540_vm5, %v4755_v60 }
 0xa56   :  { %3646 = vmatprep.mubr.msk.bf16.mxu1 %vm540_vm5, %v4762_v18 }
 0xa5d   :  { %3647 = vmatmul.mubr.msk.bf16.gmra.mrb[40].mxu1 %vm540_vm5, %v4769_v30 }
 0xb20   :  { %v3640_v45 = vpop.f32.mrb[32].mxu1 }
 0xb21   :  { %1876 = vrot.lane.b32.xlu0 %v3640_v45, %s4188_s13  ;;  %v1819_v46 = vpop.f32.mrb[33].mxu1 }
 0xb22   :  { %v3641_v50 = vpop.f32.mrb[34].mxu1 }
 0xb23   :  { %1878 = vrot.lane.b32.xlu1 %v3641_v50, %s4188_s13  ;;  %v1822_v62 = vpop.f32.mrb[35].mxu1 }
 0xb25   :  { %1872 = vrot.lane.b32.xlu0 %v1819_v46, %s4188_s13 }
 0xb27   :  { %1874 = vrot.lane.b32.xlu1 %v1822_v62, %s4188_s13 }
 0xb28   :  { %v3644_v2 = vpop.f32.mrb[36].mxu1 }
 0xb29   :  { %1902 = vrot.lane.b32.xlu0 %v3644_v2, %s4189_s14  ;;  %v4779_v58 = vpop.f32.mrb[37].mxu1 }
 0xb2a   :  { %v3645_v8 = vpop.f32.mrb[38].mxu1 }
 0xb2b   :  { %1904 = vrot.lane.b32.xlu1 %v3645_v8, %s4189_s14  ;;  %v4782_v36 = vpop.f32.mrb[39].mxu1 }
 0xb2d   :  { %1880 = vrot.lane.b32.xlu0 %v4779_v58, %s4188_s13 }
 0xb2f   :  { %1882 = vrot.lane.b32.xlu1 %v4782_v36, %s4188_s13 }
 0xb30   :  { %v3648_v0 = vpop.f32.mrb[40].mxu1 }
 0xb31   :  { %v1851_v13 = vpop.f32.mrb[41].mxu1 }
 0xb32   :  { %1906 = vrot.lane.b32.xlu0 %v1851_v13, %s4189_s14  ;;  %v3649_v39 = vpop.f32.mrb[42].mxu1 }
 0xb33   :  { %v1854_v7 = vpop.f32.mrb[43].mxu1 }
 0xb34   :  { %1908 = vrot.lane.b32.xlu1 %v1854_v7, %s4189_s14 }
 0xb36   :  { %1910 = vrot.lane.b32.xlu0 %v3648_v0, %s4189_s14 }
 0xb38   :  { %1912 = vrot.lane.b32.xlu1 %v3649_v39, %s4189_s14 }
 0xb3a   :  { %1962 = vrot.lane.b32.xlu0 %v1819_v46, %s4190_s0 }
 0xb3c   :  { %1964 = vrot.lane.b32.xlu1 %v1822_v62, %s4190_s0 }
 0xb3e   :  { %1968 = vrot.lane.b32.xlu0 %v3641_v50, %s4190_s0 }
 0xb40   :  { %1966 = vrot.lane.b32.xlu1 %v3640_v45, %s4190_s0 }
 0xb93   :  { %v1877_v49 = vpop.permute.xlu0 %1876 }
 0xb94   :  { %v1892_v2 = vadd.f32 %v1877_v49, %v1766_v63 }
 0xb95   :  { %v1879_v53 = vpop.permute.xlu1 %1878 }
 0xb96   :  { %v1893_v39 = vadd.f32 %v1879_v53, %v1771_v1 }
 0xb97   :  { %v1873_v26 = vpop.permute.xlu0 %1872 }
 0xb98   :  { %v1890_v10 = vadd.f32 %v1873_v26, %v1756_v34  ;;  %v1776_v26 = vadd.f32 %v4750_v28, %v1670_v5 }
 0xb99   :  { %v1875_v25 = vpop.permute.xlu1 %1874 }
 0xb9a   :  { %v1891_v21 = vadd.f32 %v1875_v25, %v1761_v55 }
 0xb9b   :  { %v1903_v14 = vpop.permute.xlu0 %1902 }
 0xb9c   :  { %v1920_v35 = vadd.f32 %v1903_v14, %v1890_v10  ;;  %v1781_v14 = vadd.f32 %v4748_v20, %v1670_v5 }
 0xb9d   :  { %v1905_v37 = vpop.permute.xlu1 %1904 }
 0xb9e   :  { %v3258_v38 = vmul.f32 -1.442695, %v1920_v35  ;;  %v2094_v45 = vmul.f32 %v2093_v4, %v1920_v35  ;;  %v1921_v46 = vadd.f32 %v1905_v37, %v1891_v21 }
 0xb9f   :  { %v1881_v50 = vpop.permute.xlu0 %1880 }
 0xba0   :  { %4017 = vpow2.f32 %v3258_v38  ;;  %v2104_v56 = vadd.f32 %v4802_v57, %v2094_v45  ;;  %v3259_v54 = vmul.f32 -1.442695, %v1921_v46  ;;  %v2095_v52 = vmul.f32 %v2093_v4, %v1921_v46 }
 0xba1   :  { %v1883_v19 = vpop.permute.xlu1 %1882  ;;  %v1894_v24 = vadd.f32 %v1881_v50, %v1776_v26 }
 0xba2   :  { %v2110_v62 = vmax.f32 %v2104_v56, 0.0  ;;  %4019 = vpow2.f32 %v3259_v54  ;;  %v2105_v22 = vadd.f32 %v4802_v57, %v2095_v52  ;;  %v1895_v35 = vadd.f32 %v1883_v19, %v1781_v14 }
 0xba4   :  { %v2118_v8 = vadd.f32 %v2110_v62, %v4668_v42  ;;  %v2111_v0 = vmax.f32 %v2105_v22, 0.0  ;;  %v1907_v13 = vpop.permute.xlu0 %1906 }
 0xba5   :  { %v1922_v7 = vadd.f32 %v1907_v13, %v1892_v2 }
 0xba6   :  { %v2119_v34 = vadd.f32 %v2111_v0, %v4686_v51  ;;  %v1909_v25 = vpop.permute.xlu1 %1908  ;;  %3679 = vmatprep.mubr.msk.f32.mxu1 %vm310_vm4, %v2118_v8 }
 0xba7   :  { %v3260_v15 = vmul.f32 -1.442695, %v1922_v7  ;;  %v2096_v55 = vmul.f32 %v2093_v4, %v1922_v7  ;;  %v1923_v10 = vadd.f32 %v1909_v25, %v1893_v39 }
 0xba8   :  { %v1911_v49 = vpop.permute.xlu0 %1910  ;;  %3680 = vmatmul.mubr.msk.f32.vlgmr.msra.gmra.mrb[30].mxu1 %vm310_vm4, %v2119_v34 }
 0xba9   :  { %4021 = vpow2.f32 %v3260_v15  ;;  %v2106_v42 = vadd.f32 %v4802_v57, %v2096_v55  ;;  %v3261_v53 = vmul.f32 -1.442695, %v1923_v10  ;;  %v2097_v21 = vmul.f32 %v2093_v4, %v1923_v10 }
 0xbaa   :  { %v4018_v28 = vpop.eup %4017  ;;  %v1924_v51 = vadd.f32 %v1911_v49, %v1894_v24  ;;  %v1913_v37 = vpop.permute.xlu1 %1912 }
 0xbab   :  { %v1944_v38 = vadd.f32 1.0, %v4018_v28  ;;  %v2112_v45 = vmax.f32 %v2106_v42, 0.0  ;;  %4023 = vpow2.f32 %v3261_v53  ;;  %v2107_v46 = vadd.f32 %v4802_v57, %v2097_v21 }
 0xbac   :  { %v4020_v56 = vpop.eup %4019  ;;  %v3262_v20 = vmul.f32 -1.442695, %v1924_v51  ;;  %v2098_v5 = vmul.f32 %v2093_v4, %v1924_v51  ;;  %v1925_v50 = vadd.f32 %v1913_v37, %v1895_v35  ;;  %v1963_v53 = vpop.permute.xlu0 %1962 }
 0xbad   :  { %4025 = vrcp.f32 %v1944_v38  ;;  %v1945_v54 = vadd.f32 1.0, %v4020_v56  ;;  %v2120_v52 = vadd.f32 %v2112_v45, %v4690_v9  ;;  %v2113_v63 = vmax.f32 %v2107_v46, 0.0 }
 0xbae   :  { %4027 = vpow2.f32 %v3262_v20  ;;  %v2108_v62 = vadd.f32 %v4802_v57, %v2098_v5  ;;  %v3263_v19 = vmul.f32 -1.442695, %v1925_v50  ;;  %v2099_v22 = vmul.f32 %v2093_v4, %v1925_v50  ;;  %v1965_v28 = vpop.permute.xlu1 %1964 }
 0xbaf   :  { %4029 = vrcp.f32 %v1945_v54  ;;  %v2121_v1 = vadd.f32 %v2113_v63, %v4697_v47  ;;  %3682 = vmatprep.mubr.msk.f32.mxu1 %vm310_vm4, %v2120_v52 }
 0xbb0   :  { %v2114_v2 = vmax.f32 %v2108_v62, 0.0  ;;  %4031 = vpow2.f32 %v3263_v19  ;;  %v2109_v8 = vadd.f32 %v4802_v57, %v2099_v22  ;;  %v1969_v21 = vpop.permute.xlu0 %1968 }
 0xbb1   :  { %3683 = vmatmul.mubr.msk.f32.gmra.mrb[44].mxu1 %vm310_vm4, %v2121_v1 }
 0xbb2   :  { %v2122_v0 = vadd.f32 %v2114_v2, %v4700_v17  ;;  %v2115_v9 = vmax.f32 %v2109_v8, 0.0  ;;  %v1967_v20 = vpop.permute.xlu1 %1966 }
 0xbb3   :  { %v4022_v13 = vpop.eup %4021 }
 0xbb4   :  { %v1946_v39 = vadd.f32 1.0, %v4022_v13  ;;  %v2123_v7 = vadd.f32 %v2115_v9, %v4707_v48  ;;  %3685 = vmatprep.mubr.msk.f32.mxu1 %vm310_vm4, %v2122_v0 }
 0xbb5   :  { %v4024_v4 = vpop.eup %4023 }
 0xbb6   :  { %v1947_v26 = vadd.f32 1.0, %v4024_v4  ;;  %3686 = vmatmul.mubr.msk.f32.gmra.mrb[46].mxu1 %vm310_vm4, %v2123_v7  ;;  %4033 = vrcp.f32 %v1946_v39 }
 0xbb7   :  { %v4026_v47 = vpop.eup %4025  ;;  %3708 = vmatprep.mubr.msk.bf16.mxu1 %vm4192_vm6, %v4191_v33 }
 0xbb8   :  { %v4028_v57 = vpop.eup %4027  ;;  %4035 = vrcp.f32 %v1947_v26  ;;  %v1980_v51 = vmul.f32 %v4026_v47, %v1963_v53  ;;  %v2127_v53 = vld [vmem:[#allocation2 + $0xd0] sm:$0xff] }
 0xbb9   :  { %v4030_v34 = vpop.eup %4029  ;;  %v1948_v17 = vadd.f32 1.0, %v4028_v57 }
 0xbba   :  { %v4032_v25 = vpop.eup %4031  ;;  %v3924_v15 = vpack.i.bf16 %v4030_v34, %v4026_v47  ;;  %v1981_v37 = vmul.f32 %v4030_v34, %v1965_v28 }
 0xbbb   :  { %v1949_v55 = vadd.f32 1.0, %v4032_v25  ;;  %4037 = vrcp.f32 %v1948_v17 }
 0xbbc   :  { %3925 = vrot.lane.b32.xlu0 %v3924_v15, %s4189_s14 }
 0xbbd   :  { %4039 = vrcp.f32 %v1949_v55 }
 0xbc0   :  { %1970 = vrot.lane.b32.xlu0 %v4779_v58, %s4190_s0  ;;  %v4034_v48 = vpop.eup %4033 }
 0xbc1   :  { %v1982_v50 = vmul.f32 %v4034_v48, %v1967_v20 }
 0xbc2   :  { %v4036_v10 = vpop.eup %4035 }
 0xbc3   :  { %v3929_v14 = vpack.i.bf16 %v4036_v10, %v4034_v48  ;;  %v1983_v5 = vmul.f32 %v4036_v10, %v1969_v21  ;;  %v2128_v21 = vld [vmem:[#allocation2 + $0xd8] sm:$0xff] }
 0xbc4   :  { %v3841_v28 = vpack.c.bf16 %v2128_v21, %v2127_v53 }
 0xbc5   :  { %3930 = vrot.lane.b32.xlu1 %v3929_v14, %s4189_s14  ;;  %v4038_v24 = vpop.eup %4037 }
 0xbc7   :  { %v4040_v49 = vpop.eup %4039 }
 0xbc8   :  { %v3934_v42 = vpack.i.bf16 %v4040_v49, %v4038_v24 }
 0xbc9   :  { %1972 = vrot.lane.b32.xlu1 %v4782_v36, %s4190_s0 }
 0xbca   :  { %3935 = vrot.lane.b32.xlu0 %v3934_v42, %s4189_s14 }
 0xc2e   :  { %v3926_v35 = vpop.permute.xlu0 %3925 }
 0xc2f   :  { %v3928_v58 = vunpack.i.h.bf16 %v3926_v35  ;;  %v3927_v38 = vunpack.i.l.bf16 %v3926_v35 }
 0xc31   :  { %v2011_v45 = vsel %vm310_vm4, %v1981_v37, %v3928_v58  ;;  %v2010_v46 = vsel %vm310_vm4, %v1980_v51, %v3927_v38  ;;  %v2079_v58 = vrot.slane %v4716_v3, %v4530_v29 }
 0xc32   :  { %v2016_v56 = vpack.c.bf16 %v2011_v45, %v2010_v46  ;;  %v1971_v54 = vpop.permute.xlu0 %1970  ;;  %v2085_v46 = vrot.slane %v4716_v3, %v4533_v11  ;;  %v4880_v3 = vld [vmem:[%s5039_s5 + $0x18] sm:$0xff] }
 0xc33   :  { %v1984_v0 = vmul.f32 %v4038_v24, %v1971_v54 }
 0xc34   :  { %3651 = vmatpush3.bf16.msra.mxu0 %v2016_v56 }
 0xc35   :  { %3652 = vmatprep.subr.bf16.mxu0 %v4191_v33 }
 0xc37   :  { %v3931_v36 = vpop.permute.xlu1 %3930 }
 0xc38   :  { %v3933_v52 = vunpack.i.h.bf16 %v3931_v36  ;;  %v3932_v63 = vunpack.i.l.bf16 %v3931_v36 }
 0xc3a   :  { %v2013_v62 = vsel %vm310_vm4, %v1983_v5, %v3933_v52  ;;  %v2012_v19 = vsel %vm310_vm4, %v1982_v50, %v3932_v63 }
 0xc3b   :  { %v2017_v22 = vpack.c.bf16 %v2013_v62, %v2012_v19  ;;  %v1973_v1 = vpop.permute.xlu1 %1972 }
 0xc3c   :  { %v1985_v2 = vmul.f32 %v4040_v49, %v1973_v1  ;;  %v3936_v8 = vpop.permute.xlu0 %3935  ;;  %v2126_v49 = vld [vmem:[#allocation2 + $0xc8] sm:$0xff] }
 0xc3d   :  { %v3938_v9 = vunpack.i.h.bf16 %v3936_v8  ;;  %v3937_v13 = vunpack.i.l.bf16 %v3936_v8  ;;  %3653 = vmatpush3.bf16.msra.mxu0 %v2017_v22 }
 0xc3e   :  { %3654 = vmatprep.subr.bf16.mxu0 %v4191_v33 }
 0xc3f   :  { %v2015_v39 = vsel %vm310_vm4, %v1985_v2, %v3938_v9  ;;  %v2014_v7 = vsel %vm310_vm4, %v1984_v0, %v3937_v13 }
 0xc40   :  { %v2018_v4 = vpack.c.bf16 %v2015_v39, %v2014_v7 }
 0xc42   :  { %3655 = vmatpush3.bf16.msra.mxu0 %v2018_v4 }
 0xc45   :  { %3657 = vmatmul.mubr.msk.bf16.vlgmr.msra.gmra.mrb[36].mxu0 %vm798_vm7, %v4511_v12  ;;  %v2125_v12 = vld [vmem:[#allocation2 + $0xc0] sm:$0xff] }
 0xc46   :  { %v3837_v42 = vpack.c.bf16 %v2126_v49, %v2125_v12 }
 0xc48   :  { %3838 = vmatprep.subr.bf16.mxu0 %v3837_v42 }
 0xc49   :  { %3840 = vmatpush3.bf16.msra.mxu0 %v3837_v42 }
 0xc4a   :  { %3842 = vmatprep.subr.bf16.mxu0 %v3841_v28 }
 0xc4d   :  { %3844 = vmatpush3.bf16.msra.mxu0 %v3841_v28 }
 0xc7b   :  { %v4845_v26 = vpop.f32.mrb[30].mxu1 }
 0xc7c   :  { %v4847_v47 = vpop.f32.mrb[31].mxu1 }
 0xc84   :  { %v4849_v57 = vpop.f32.mrb[44].mxu1 }
 0xc85   :  { %v4851_v34 = vpop.f32.mrb[45].mxu1 }
 0xc89   :  { %v4853_v17 = vpop.f32.mrb[46].mxu1 }
 0xc8a   :  { %v4855_v25 = vpop.f32.mrb[47].mxu1 }
 0xd18   :  { %v2053_v15 = vpop.f32.mrb[36].mxu0 }
 0xd19   :  { %v2060_v55 = vadd.f32 1e-06, %v2053_v15  ;;  %v3658_v48 = vpop.f32.mrb[37].mxu0 }
 0xd1a   :  { %v2056_v10 = vpop.f32.mrb[38].mxu0 }
 0xd1b   :  { %4041 = vrcp.f32 %v2060_v55  ;;  %v2061_v14 = vadd.f32 1e-06, %v2056_v10  ;;  %v3659_v24 = vpop.f32.mrb[39].mxu0 }
 0xd1c   :  { %v2223_v24 = vrot.slane %v4880_v3, %v4430_v16 }
 0xd1d   :  { %4043 = vrcp.f32 %v2061_v14 }
 0xd1e   :  { %v2309_v42 = vadd.f32 %v4847_v47, %v2223_v24  ;;  %v2314_v21 = vadd.f32 %v4845_v26, %v2223_v24  ;;  %v2329_v26 = vadd.f32 %v4855_v25, %v2223_v24 }
 0xd25   :  { %v4042_v35 = vpop.eup %4041 }
 0xd26   :  { %2066 = vrot.lane.b32.xlu1 %v4042_v35, %s4190_s0 }
 0xd27   :  { %v4044_v51 = vpop.eup %4043 }
 0xd28   :  { %2068 = vrot.lane.b32.xlu0 %v4044_v51, %s4190_s0 }
 0xd98   :  { %v2067_v37 = vpop.permute.xlu1 %2066 }
 0xd99   :  { %v2072_v38 = vmul.f32 %v2067_v37, %v2053_v15 }
 0xd9a   :  { %v2069_v45 = vpop.permute.xlu0 %2068 }
 0xd9b   :  { %v2074_v56 = vadd.f32 %v2072_v38, %v4726_v40  ;;  %v2073_v20 = vmul.f32 %v2069_v45, %v2056_v10 }
 0xd9d   :  { %v2080_v36 = vmul.f32 %v2079_v58, %v2074_v56  ;;  %v2075_v5 = vadd.f32 %v2073_v20, %v4722_v31  ;;  %v2319_v20 = vadd.f32 %v4851_v34, %v2223_v24 }
 0xd9f   :  { %v2086_v50 = vadd.f32 %v2085_v46, %v2080_v36  ;;  %v2081_v54 = vmul.f32 %v2079_v58, %v2075_v5  ;;  %v2324_v36 = vadd.f32 %v4849_v57, %v2223_v24 }
 0xda1   :  { %v2088_v52 = vmax.f32 %v2086_v50, 0.0  ;;  %v2087_v63 = vadd.f32 %v2085_v46, %v2081_v54 }
 0xda3   :  { %v2089_v62 = vmax.f32 %v2087_v63, 0.0  ;;  %v4866_v19 = vadd.f32 %v2088_v52, %v4657_v44  ;;  %v2138_v44 = vrot.slane %v4880_v3, %v4347_v43  ;;  %v2334_v63 = vadd.f32 %v4853_v17, %v2223_v24 }
 0xda5   :  { %v4869_v22 = vadd.f32 %v2089_v62, %v4661_v27  ;;  %3668 = vmatprep.mubr.msk.f32.mxu0 %vm310_vm4, %v4866_v19 }
 0xda7   :  { %3669 = vmatmul.mubr.msk.f32.vlgmr.msra.gmra.mrb[40].mxu0 %vm310_vm4, %v4869_v22 }
 0xda8   :  { %3690 = vmatprep.mubr.msk.bf16.mxu0 %vm540_vm5, %v4681_v6 }
 0xe7a   :  { %v3670_v31 = vpop.f32.mrb[40].mxu0 }
 0xe7b   :  { %v4884_v27 = vadd.f32 %v3670_v31, %v2138_v44  ;;  %v2211_v40 = vpop.f32.mrb[41].mxu0 }
 0xe7c   :  { %v4886_v1 = vadd.f32 %v2211_v40, %v2138_v44 }
 0xe7e   :  { %v2337_v2 = vpack.c.bf16 %v4884_v27, %v4886_v1 }
 0xe80   :  { %3688 = vmatprep.subr.bf16.mxu0 %v2337_v2 }
 0xe81   :  { %3689 = vmatpush3.bf16.msra.mxu0 %v2337_v2 }
 0xe84   :  { %3691 = vmatmul.mubr.msk.bf16.vlgmr.msra.gmra.mrb[44].mxu0 %vm540_vm5, %v4733_v61 }
 0xe85   :  { %3694 = vmatprep.mubr.msk.bf16.mxu0 %vm540_vm5, %v4740_v23 }
 0xe8c   :  { %3695 = vmatmul.mubr.msk.bf16.gmra.mrb[48].mxu0 %vm540_vm5, %v4755_v60 }
 0xe8d   :  { %3698 = vmatprep.mubr.msk.bf16.mxu0 %vm540_vm5, %v4762_v18 }
 0xe94   :  { %3699 = vmatmul.mubr.msk.bf16.gmra.mrb[52].mxu0 %vm540_vm5, %v4769_v30 }
 0xf57   :  { %v3692_v43 = vpop.f32.mrb[44].mxu0 }
 0xf58   :  { %2429 = vrot.lane.b32.xlu1 %v3692_v43, %s4188_s13  ;;  %v2372_v8 = vpop.f32.mrb[45].mxu0 }
 0xf59   :  { %v3693_v0 = vpop.f32.mrb[46].mxu0 }
 0xf5a   :  { %2431 = vrot.lane.b32.xlu0 %v3693_v0, %s4188_s13  ;;  %v2375_v9 = vpop.f32.mrb[47].mxu0 }
 0xf5c   :  { %2425 = vrot.lane.b32.xlu1 %v2372_v8, %s4188_s13 }
 0xf5e   :  { %2427 = vrot.lane.b32.xlu0 %v2375_v9, %s4188_s13 }
 0xf5f   :  { %v3696_v13 = vpop.f32.mrb[48].mxu0 }
 0xf60   :  { %2455 = vrot.lane.b32.xlu1 %v3696_v13, %s4189_s14  ;;  %v4905_v39 = vpop.f32.mrb[49].mxu0 }
 0xf61   :  { %v3697_v7 = vpop.f32.mrb[50].mxu0 }
 0xf62   :  { %2457 = vrot.lane.b32.xlu0 %v3697_v7, %s4189_s14  ;;  %v4908_v4 = vpop.f32.mrb[51].mxu0 }
 0xf64   :  { %2433 = vrot.lane.b32.xlu1 %v4905_v39, %s4188_s13 }
 0xf66   :  { %2435 = vrot.lane.b32.xlu0 %v4908_v4, %s4188_s13 }
 0xf67   :  { %v3700_v15 = vpop.f32.mrb[52].mxu0 }
 0xf68   :  { %v2404_v55 = vpop.f32.mrb[53].mxu0 }
 0xf69   :  { %2459 = vrot.lane.b32.xlu1 %v2404_v55, %s4189_s14  ;;  %v3701_v48 = vpop.f32.mrb[54].mxu0 }
 0xf6a   :  { %v2407_v10 = vpop.f32.mrb[55].mxu0 }
 0xf6b   :  { %2461 = vrot.lane.b32.xlu0 %v2407_v10, %s4189_s14 }
 0xf6d   :  { %2463 = vrot.lane.b32.xlu1 %v3700_v15, %s4189_s14 }
 0xf6f   :  { %2465 = vrot.lane.b32.xlu0 %v3701_v48, %s4189_s14 }
 0xf71   :  { %2515 = vrot.lane.b32.xlu1 %v2372_v8, %s4190_s0 }
 0xf73   :  { %2517 = vrot.lane.b32.xlu0 %v2375_v9, %s4190_s0 }
 0xf75   :  { %2521 = vrot.lane.b32.xlu1 %v3693_v0, %s4190_s0 }
 0xf77   :  { %2519 = vrot.lane.b32.xlu0 %v3692_v43, %s4190_s0 }
 0xfca   :  { %v2430_v14 = vpop.permute.xlu1 %2429 }
 0xfcb   :  { %v2445_v47 = vadd.f32 %v2430_v14, %v2319_v20 }
 0xfcc   :  { %v2432_v12 = vpop.permute.xlu0 %2431 }
 0xfcd   :  { %v2446_v50 = vadd.f32 %v2432_v12, %v2324_v36 }
 0xfce   :  { %v2426_v49 = vpop.permute.xlu1 %2425 }
 0xfcf   :  { %v2443_v28 = vadd.f32 %v2426_v49, %v2309_v42 }
 0xfd0   :  { %v2428_v53 = vpop.permute.xlu0 %2427 }
 0xfd1   :  { %v2444_v51 = vadd.f32 %v2428_v53, %v2314_v21 }
 0xfd2   :  { %v2456_v35 = vpop.permute.xlu1 %2455 }
 0xfd3   :  { %v2473_v37 = vadd.f32 %v2456_v35, %v2443_v28 }
 0xfd4   :  { %v2458_v58 = vpop.permute.xlu0 %2457 }
 0xfd5   :  { %v3280_v38 = vmul.f32 -1.442695, %v2473_v37  ;;  %v2474_v45 = vadd.f32 %v2458_v58, %v2444_v51 }
 0xfd6   :  { %v2434_v46 = vpop.permute.xlu1 %2433 }
 0xfd7   :  { %4045 = vpow2.f32 %v3280_v38  ;;  %v3281_v56 = vmul.f32 -1.442695, %v2474_v45  ;;  %v2447_v62 = vadd.f32 %v2434_v46, %v2329_v26 }
 0xfd8   :  { %v2436_v16 = vpop.permute.xlu0 %2435 }
 0xfd9   :  { %4047 = vpow2.f32 %v3281_v56  ;;  %v2448_v2 = vadd.f32 %v2436_v16, %v2334_v63 }
 0xfdb   :  { %v2460_v5 = vpop.permute.xlu1 %2459 }
 0xfdc   :  { %v2475_v54 = vadd.f32 %v2460_v5, %v2445_v47 }
 0xfdd   :  { %v2462_v52 = vpop.permute.xlu0 %2461 }
 0xfde   :  { %v3282_v44 = vmul.f32 -1.442695, %v2475_v54  ;;  %v2476_v31 = vadd.f32 %v2462_v52, %v2446_v50 }
 0xfdf   :  { %v2464_v40 = vpop.permute.xlu1 %2463 }
 0xfe0   :  { %4049 = vpow2.f32 %v3282_v44  ;;  %v3283_v34 = vmul.f32 -1.442695, %v2476_v31  ;;  %v2477_v43 = vadd.f32 %v2464_v40, %v2447_v62 }
 0xfe1   :  { %v4046_v8 = vpop.eup %4045  ;;  %v2466_v0 = vpop.permute.xlu0 %2465 }
 0xfe2   :  { %v2497_v57 = vadd.f32 1.0, %v4046_v8  ;;  %4051 = vpow2.f32 %v3283_v34  ;;  %v3284_v9 = vmul.f32 -1.442695, %v2477_v43  ;;  %v2478_v13 = vadd.f32 %v2466_v0, %v2448_v2 }
 0xfe3   :  { %v4048_v25 = vpop.eup %4047  ;;  %v2516_v45 = vpop.permute.xlu1 %2515 }
 0xfe4   :  { %4053 = vrcp.f32 %v2497_v57  ;;  %v2498_v7 = vadd.f32 1.0, %v4048_v25  ;;  %v3285_v15 = vmul.f32 -1.442695, %v2478_v13 }
 0xfe5   :  { %4055 = vpow2.f32 %v3284_v9  ;;  %v2518_v56 = vpop.permute.xlu0 %2517 }
 0xfe6   :  { %4057 = vrcp.f32 %v2498_v7 }
 0xfe7   :  { %4059 = vpow2.f32 %v3285_v15  ;;  %v2522_v46 = vpop.permute.xlu1 %2521 }
 0xfe9   :  { %v2520_v54 = vpop.permute.xlu0 %2519 }
 0xfea   :  { %v4050_v17 = vpop.eup %4049 }
 0xfeb   :  { %v2499_v55 = vadd.f32 1.0, %v4050_v17  ;;  %v4087_v17 = vld [vmem:[%s5037_s3] sm:$0xff]   ;;  %s4193_s3 = smov [#allocation8]  }
 0xfec   :  { %v4052_v48 = vpop.eup %4051  ;;  %s3161_s12 = sshll.u32 %s4193_s3, 4  ;;  %s3162_s12 = int_to_ptr.vmem [resolvable:$true] %s3161_s12 }
 0xfed   :  { %v2500_v10 = vadd.f32 1.0, %v4052_v48  ;;  %4061 = vrcp.f32 %v2499_v55  ;;  %s4132_s13 = scalar_lea.vmem %s3162_s12, 256  ;;  %p4137_p3 = scmp.lt.s32.totalorder %s3162_s12, %s3162_s12 }
 0xfee   :  { %v4054_v14 = vpop.eup %4053  ;;  %p4133_p2 = scmp.ne.s32.totalorder %s3162_s12, %s4132_s13  ;;  %p4138_p4 = scmp.lt.s32.totalorder %s4132_s13, %s4132_s13 }
 0xfef   :  { %v4056_v24 = vpop.eup %4055  ;;  %4063 = vrcp.f32 %v2500_v10  ;;  %v2533_v16 = vmul.f32 %v4054_v14, %v2516_v45 }
 0xff0   :  { %v4058_v12 = vpop.eup %4057  ;;  %v2501_v49 = vadd.f32 1.0, %v4056_v24  ;;  %p4139_p5 = por %p4138_p4, %p4137_p3 }
 0xff1   :  { %v4060_v42 = vpop.eup %4059  ;;  %v3939_v53 = vpack.i.bf16 %v4058_v12, %v4054_v14  ;;  %v2534_v36 = vmul.f32 %v4058_v12, %v2518_v56 }
 0xff2   :  { %v2502_v21 = vadd.f32 1.0, %v4060_v42  ;;  %4065 = vrcp.f32 %v2501_v49  ;;  %p4140_p6 = pnand %p4139_p5, %p4133_p2 }
 0xff3   :  { %3940 = vrot.lane.b32.xlu1 %v3939_v53, %s4189_s14  ;;  %v2632_v53 = vrot.slane %v4880_v3, %v4530_v29 }
 0xff4   :  { %4067 = vrcp.f32 %v2502_v21 }
 0xff7   :  { %2523 = vrot.lane.b32.xlu1 %v4905_v39, %s4190_s0  ;;  %v4062_v28 = vpop.eup %4061 }
 0xff8   :  { %v2535_v63 = vmul.f32 %v4062_v28, %v2520_v54 }
 0xff9   :  { %v4064_v35 = vpop.eup %4063 }
 0xffa   :  { %v3944_v51 = vpack.i.bf16 %v4064_v35, %v4062_v28  ;;  %v2536_v52 = vmul.f32 %v4064_v35, %v2522_v46  ;;  %v2638_v28 = vrot.slane %v4880_v3, %v4533_v11  ;;  %v2757_v11 = vld [vmem:[#allocation5 + $0x48] sm:$0xff] }
 0xffc   :  { %3945 = vrot.lane.b32.xlu0 %v3944_v51, %s4189_s14  ;;  %v4066_v37 = vpop.eup %4065 }
 0xffe   :  { %v4068_v58 = vpop.eup %4067 }
 0xfff   :  { %v3949_v38 = vpack.i.bf16 %v4068_v58, %v4066_v37 }
0x1000   :  { %2525 = vrot.lane.b32.xlu0 %v4908_v4, %s4190_s0 }
0x1001   :  { %3950 = vrot.lane.b32.xlu1 %v3949_v38, %s4189_s14 }
0x1065   :  { %v3941_v20 = vpop.permute.xlu1 %3940 }
0x1066   :  { %v3943_v39 = vunpack.i.h.bf16 %v3941_v20  ;;  %v3942_v47 = vunpack.i.l.bf16 %v3941_v20 }
0x1068   :  { %v2563_v5 = vsel %vm310_vm4, %v2533_v16, %v3942_v47  ;;  %v2564_v26 = vsel %vm310_vm4, %v2534_v36, %v3943_v39  ;;  %v2761_v39 = vld [vmem:[#allocation5 + $0x68] sm:$0xff]  ;;  %v2763_v47 = vld [vmem:[#allocation5 + $0x78] sm:$0xff] }
0x1069   :  { %v2569_v50 = vpack.c.bf16 %v2564_v26, %v2563_v5  ;;  %v2524_v62 = vpop.permute.xlu1 %2523 }
0x106a   :  { %v2537_v57 = vmul.f32 %v4066_v37, %v2524_v62 }
0x106b   :  { %3703 = vmatpush3.bf16.msra.mxu1 %v2569_v50 }
0x106c   :  { %3704 = vmatprep.subr.bf16.mxu1 %v4191_v33 }
0x106e   :  { %v3946_v4 = vpop.permute.xlu0 %3945 }
0x106f   :  { %v3948_v44 = vunpack.i.h.bf16 %v3946_v4  ;;  %v3947_v31 = vunpack.i.l.bf16 %v3946_v4 }
0x1071   :  { %v2566_v40 = vsel %vm310_vm4, %v2536_v52, %v3948_v44  ;;  %v2565_v2 = vsel %vm310_vm4, %v2535_v63, %v3947_v31 }
0x1072   :  { %v2570_v34 = vpack.c.bf16 %v2566_v40, %v2565_v2  ;;  %v2526_v43 = vpop.permute.xlu0 %2525  ;;  %v3240_v2 = vld [vmem:[#allocation5 + $0x40] ss:$0 sm:$0xff] }
0x1073   :  { %v3951_v8 = vpop.permute.xlu1 %3950  ;;  %v2538_v0 = vmul.f32 %v4068_v58, %v2526_v43  ;;  %v1553_v43 = vand.u32 127, %v306_v41 }
0x1074   :  { %v3953_v9 = vunpack.i.h.bf16 %v3951_v8  ;;  %v3952_v13 = vunpack.i.l.bf16 %v3951_v8  ;;  %3705 = vmatpush3.bf16.msra.mxu1 %v2570_v34  ;;  %v1542_v34 = vadd.f32 %v3240_v2, %v4724_v59 }
0x1075   :  { %3706 = vmatprep.subr.bf16.mxu1 %v4191_v33  ;;  %vm1554_vm8 = vcmp.lt.s32.totalorder %v1553_v43, 8 }
0x1076   :  { %v2567_v25 = vsel %vm310_vm4, %v2537_v57, %v3952_v13  ;;  %v2568_v7 = vsel %vm310_vm4, %v2538_v0, %v3953_v9  ;;  %v1550_v8 = vmul.f32 2.0, %v1542_v34  ;;  %v1547_v0 = vadd.f32 %v4720_v32, %v3240_v2 }
0x1077   :  { %v2571_v15 = vpack.c.bf16 %v2568_v7, %v2567_v25  ;;  %v2890_v25 = vld [vmem:[#allocation5 + $0x90] sm:$0xff]  ;;  %v2891_v7 = vld [vmem:[#allocation5 + $0x98] sm:$0xff] }
0x1078   :  { %v1555_v57 = vsel %vm1554_vm8, %v1550_v8, -1e+30  ;;  %v1551_v9 = vmul.f32 2.0, %v1547_v0 }
0x1079   :  { %3707 = vmatpush3.bf16.msra.mxu1 %v2571_v15  ;;  %v3869_v15 = vpack.c.bf16 %v2891_v7, %v2890_v25 }
0x107a   :  { %v1556_v13 = vsel %vm1554_vm8, %v1551_v9, -1e+30 }
0x107c   :  { %3709 = vmatmul.mubr.msk.bf16.vlgmr.msra.gmra.mrb[48].mxu1 %vm798_vm7, %v4087_v17 }
0x107d   :  { %3714 = vmatprep.mubr.msk.bf16.mxu1 %vm540_vm5, %v4681_v6 }
0x114f   :  { %v2606_v55 = vpop.f32.mrb[48].mxu1 }
0x1150   :  { %v2613_v48 = vadd.f32 1e-06, %v2606_v55  ;;  %v3710_v10 = vpop.f32.mrb[49].mxu1 }
0x1151   :  { %v2609_v14 = vpop.f32.mrb[50].mxu1 }
0x1152   :  { %4069 = vrcp.f32 %v2613_v48  ;;  %v2614_v33 = vadd.f32 1e-06, %v2609_v14  ;;  %v3711_v24 = vpop.f32.mrb[51].mxu1 }
0x1154   :  { %4071 = vrcp.f32 %v2614_v33 }
0x115c   :  { %v4070_v12 = vpop.eup %4069 }
0x115d   :  { %2619 = vrot.lane.b32.xlu0 %v4070_v12, %s4190_s0 }
0x115e   :  { %v4072_v49 = vpop.eup %4071 }
0x115f   :  { %2621 = vrot.lane.b32.xlu1 %v4072_v49, %s4190_s0 }
0x11cf   :  { %v2620_v42 = vpop.permute.xlu0 %2619 }
0x11d0   :  { %v2625_v21 = vmul.f32 %v2620_v42, %v2606_v55 }
0x11d1   :  { %v2622_v6 = vpop.permute.xlu1 %2621 }
0x11d2   :  { %v2627_v35 = vadd.f32 %v2625_v21, %v4886_v1  ;;  %v2626_v51 = vmul.f32 %v2622_v6, %v2609_v14 }
0x11d4   :  { %v2633_v37 = vmul.f32 %v2632_v53, %v2627_v35  ;;  %v2628_v58 = vadd.f32 %v2626_v51, %v4884_v27  ;;  %v2760_v27 = vld [vmem:[#allocation5 + $0x60] sm:$0xff] }
0x11d6   :  { %v2639_v38 = vadd.f32 %v2638_v28, %v2633_v37  ;;  %v2634_v45 = vmul.f32 %v2632_v53, %v2628_v58  ;;  %v2892_v37 = vld [vmem:[#allocation5 + $0xa0] sm:$0xff]  ;;  %v2893_v58 = vld [vmem:[#allocation5 + $0xa8] sm:$0xff] }
0x11d8   :  { %v2641_v46 = vmax.f32 %v2639_v38, 0.0  ;;  %v2640_v56 = vadd.f32 %v2638_v28, %v2634_v45  ;;  %v3873_v38 = vpack.c.bf16 %v2893_v58, %v2892_v37 }
0x11da   :  { %v2642_v20 = vmax.f32 %v2640_v56, 0.0  ;;  %v2643_v16 = vadd.f32 %v2641_v46, %v4866_v19  ;;  %v2758_v19 = vld [vmem:[#allocation5 + $0x50] sm:$0xff]  ;;  %v3018_v46 = vld [vmem:[#allocation5 + $0xb8] sm:$0xff]  ;;  %v3019_v56 = vld [vmem:[#allocation5 + $0xc0] sm:$0xff] }
0x11db   :  { %v3853_v3 = vpack.c.bf16 %v2758_v19, %v2757_v11 }
0x11dc   :  { %v2644_v29 = vadd.f32 %v2642_v20, %v4869_v22  ;;  %v2759_v22 = vld [vmem:[#allocation5 + $0x58] sm:$0xff]  ;;  %v3877_v20 = vpack.c.bf16 %v3019_v56, %v3018_v46 }
0x11dd   :  { %v3857_v1 = vpack.c.bf16 %v2760_v27, %v2759_v22  ;;  %3854 = vmatprep.subr.bf16.mxu0 %v3853_v3 }
0x11de   :  { %v2645_v36 = vpack.c.bf16 %v2644_v29, %v2643_v16  ;;  %3856 = vmatpush3.bf16.msra.mxu0 %v3853_v3  ;;  %v3293_v16 = vld [vmem:[#allocation5 + $0x88] ss:$0 sm:$0xff] }
0x11df   :  { %3858 = vmatprep.subr.bf16.mxu0 %v3857_v1 }
0x11e0   :  { %3712 = vmatprep.subr.bf16.mxu1 %v2645_v36 }
0x11e1   :  { %3713 = vmatpush3.bf16.msra.mxu1 %v2645_v36 }
0x11e2   :  { %3860 = vmatpush3.bf16.msra.mxu0 %v3857_v1  ;;  %3878 = vmatprep.subr.bf16.mxu1 %v3877_v20 }
0x11e4   :  { %3715 = vmatmul.mubr.msk.bf16.vlgmr.msra.gmra.mrb[52].mxu1 %vm540_vm5, %v4733_v61  ;;  %v2762_v61 = vld [vmem:[#allocation5 + $0x70] sm:$0xff] }
0x11e5   :  { %3718 = vmatprep.mubr.msk.bf16.mxu1 %vm540_vm5, %v4740_v23  ;;  %v3861_v23 = vpack.c.bf16 %v2762_v61, %v2761_v39  ;;  %3880 = vmatpush3.bf16.msra.mxu1 %v3877_v20 }
0x11e7   :  { %3862 = vmatprep.subr.bf16.mxu0 %v3861_v23 }
0x11e8   :  { %3864 = vmatpush3.bf16.msra.mxu0 %v3861_v23 }
0x11ec   :  { %3719 = vmatmul.mubr.msk.bf16.gmra.mrb[56].mxu1 %vm540_vm5, %v4755_v60  ;;  %v2764_v60 = vld [vmem:[#allocation5 + $0x80] sm:$0xff] }
0x11ed   :  { %3722 = vmatprep.mubr.msk.bf16.mxu1 %vm540_vm5, %v4762_v18  ;;  %v3865_v18 = vpack.c.bf16 %v2764_v60, %v2763_v47 }
0x11ef   :  { %3866 = vmatprep.subr.bf16.mxu0 %v3865_v18 }
0x11f0   :  { %3868 = vmatpush3.bf16.msra.mxu0 %v3865_v18 }
0x11f1   :  { %3870 = vmatprep.subr.bf16.mxu0 %v3869_v15 }
0x11f4   :  { %3723 = vmatmul.mubr.msk.bf16.gmra.mrb[60].mxu1 %vm540_vm5, %v4769_v30 }
0x12b7   :  { %v3716_v30 = vpop.f32.mrb[52].mxu1 }
0x12b8   :  { %v2680_v5 = vpop.f32.mrb[53].mxu1 }
0x12b9   :  { %v3717_v26 = vpop.f32.mrb[54].mxu1 }
0x12ba   :  { %v2683_v50 = vpop.f32.mrb[55].mxu1 }
0x12bf   :  { %v3720_v54 = vpop.f32.mrb[56].mxu1 }
0x12c0   :  { %2733 = vrot.lane.b32.xlu0 %v3720_v54, %s4189_s14  ;;  %v2696_v4 = vpop.f32.mrb[57].mxu1 }
0x12c1   :  { %v3721_v52 = vpop.f32.mrb[58].mxu1 }
0x12c2   :  { %2735 = vrot.lane.b32.xlu1 %v3721_v52, %s4189_s14  ;;  %v2699_v63 = vpop.f32.mrb[59].mxu1 }
0x12c7   :  { %v3724_v62 = vpop.f32.mrb[60].mxu1 }
0x12c8   :  { %v2712_v44 = vpop.f32.mrb[61].mxu1 }
0x12c9   :  { %2737 = vrot.lane.b32.xlu0 %v2712_v44, %s4189_s14  ;;  %v3725_v31 = vpop.f32.mrb[62].mxu1 }
0x12ca   :  { %v2715_v40 = vpop.f32.mrb[63].mxu1 }
0x12cb   :  { %2739 = vrot.lane.b32.xlu1 %v2715_v40, %s4189_s14 }
0x12cd   :  { %2741 = vrot.lane.b32.xlu0 %v3724_v62, %s4189_s14 }
0x12cf   :  { %2743 = vrot.lane.b32.xlu1 %v3725_v31, %s4189_s14  ;;  %v3300_v31 = vld [vmem:[#allocation5 + $0xb0] ss:$0 sm:$0xff] }
0x12ec   :  { %1557 = vmax.xlane.f32.xlu0 %v1555_v57 }
0x12f3   :  { %1559 = vmax.xlane.f32.xlu1 %v1556_v13 }
0x1332   :  { %v2734_v17 = vpop.permute.xlu0 %2733 }
0x1333   :  { %v2751_v55 = vsel %vm310_vm4, %v2680_v5, %v2734_v17 }
0x1334   :  { %3742 = vmatprep.mubr.msk.f32.mxu0 %vm2770_vm9, %v2751_v55  ;;  %v2736_v41 = vpop.permute.xlu1 %2735 }
0x1335   :  { %v2752_v59 = vsel %vm310_vm4, %v2683_v50, %v2736_v41 }
0x1336   :  { %3743 = vmatmul.mubr.msk.f32.vlgmr.msra.gmra.mrb[42].mxu0 %vm2770_vm9, %v2752_v59 }
0x1337   :  { %3872 = vmatpush3.bf16.msra.mxu0 %v3869_v15 }
0x1338   :  { %3874 = vmatprep.subr.bf16.mxu0 %v3873_v38 }
0x133b   :  { %v2738_v32 = vpop.permute.xlu0 %2737  ;;  %3876 = vmatpush3.bf16.msra.mxu0 %v3873_v38 }
0x133c   :  { %v2753_v48 = vsel %vm310_vm4, %v3716_v30, %v2738_v32 }
0x133d   :  { %3745 = vmatprep.mubr.msk.f32.mxu0 %vm2770_vm9, %v2753_v48  ;;  %v2740_v10 = vpop.permute.xlu1 %2739 }
0x133e   :  { %v2754_v14 = vsel %vm310_vm4, %v3717_v26, %v2740_v10 }
0x133f   :  { %v2742_v33 = vpop.permute.xlu0 %2741  ;;  %3746 = vmatmul.mubr.msk.f32.gmra.mrb[56].mxu0 %vm2770_vm9, %v2754_v14 }
0x1340   :  { %v2755_v24 = vsel %vm310_vm4, %v2696_v4, %v2742_v33 }
0x1341   :  { %3748 = vmatprep.mubr.msk.f32.mxu0 %vm2770_vm9, %v2755_v24  ;;  %v2744_v12 = vpop.permute.xlu1 %2743 }
0x1342   :  { %v2756_v49 = vsel %vm310_vm4, %v2699_v63, %v2744_v12 }
0x1343   :  { %3749 = vmatmul.mubr.msk.f32.gmra.mrb[58].mxu0 %vm2770_vm9, %v2756_v49 }
0x1379   :  { %v1558_v42 = vpop.xlane.xlu0 %1557 }
0x137a   :  { %v1561_v53 = vsub.f32 %v1555_v57, %v1558_v42 }
0x137c   :  { %v1563_v21 = vmul.f32 1.442695, %v1561_v53 }
0x137e   :  { %4073 = vpow2.f32 %v1563_v21 }
0x1380   :  { %v1560_v6 = vpop.xlane.xlu1 %1559 }
0x1381   :  { %v1562_v28 = vsub.f32 %v1556_v13, %v1560_v6 }
0x1383   :  { %v1565_v35 = vmul.f32 1.442695, %v1562_v28 }
0x1385   :  { %4075 = vpow2.f32 %v1565_v35 }
0x1388   :  { %v4074_v51 = vpop.eup %4073 }
0x1389   :  { %1567 = vadd.xlane.f32.xlu0 %v4074_v51 }
0x138f   :  { %v4076_v45 = vpop.eup %4075 }
0x1390   :  { %1569 = vadd.xlane.f32.xlu0 %v4076_v45 }
0x1409   :  { %v3744_v29 = vpop.f32.mrb[42].mxu0 }
0x140a   :  { %v2861_v36 = vadd.f32 %v3744_v29, %v3293_v16  ;;  %v2855_v11 = vpop.f32.mrb[43].mxu0 }
0x140b   :  { %v2856_v19 = vadd.f32 %v3293_v16, %v2855_v11 }
0x140c   :  { %v2885_v3 = vmax.f32 %v2861_v36, 0.0 }
0x140d   :  { %v2884_v22 = vmax.f32 %v2856_v19, 0.0 }
0x140f   :  { %3759 = vmatprep.mubr.msk.f32.mxu0 %vm310_vm4, %v2884_v22 }
0x1410   :  { %3760 = vmatmul.mubr.msk.f32.vlgmr.msra.gmra.mrb[60].mxu0 %vm310_vm4, %v2885_v3 }
0x1412   :  { %v3747_v27 = vpop.f32.mrb[56].mxu0 }
0x1413   :  { %v2871_v1 = vadd.f32 %v3747_v27, %v3293_v16  ;;  %v2865_v39 = vpop.f32.mrb[57].mxu0 }
0x1414   :  { %v2866_v61 = vadd.f32 %v3293_v16, %v2865_v39 }
0x1415   :  { %v2887_v18 = vmax.f32 %v2871_v1, 0.0 }
0x1416   :  { %v2886_v23 = vmax.f32 %v2866_v61, 0.0  ;;  %v3750_v47 = vpop.f32.mrb[58].mxu0  ;;  %v1568_v60 = vpop.xlane.xlu0 %1567 }
0x1417   :  { %v2881_v30 = vadd.f32 %v3750_v47, %v3293_v16  ;;  %4077 = vrcp.f32 %v1568_v60  ;;  %v2875_v5 = vpop.f32.mrb[59].mxu0 }
0x1418   :  { %v2876_v26 = vadd.f32 %v3293_v16, %v2875_v5  ;;  %3762 = vmatprep.mubr.msk.f32.mxu0 %vm310_vm4, %v2886_v23 }
0x1419   :  { %3763 = vmatmul.mubr.msk.f32.gmra.mrb[62].mxu0 %vm310_vm4, %v2887_v18  ;;  %v2889_v54 = vmax.f32 %v2881_v30, 0.0 }
0x141a   :  { %v2888_v50 = vmax.f32 %v2876_v26, 0.0 }
0x141c   :  { %3765 = vmatprep.mubr.msk.f32.mxu0 %vm310_vm4, %v2888_v50 }
0x141d   :  { %3766 = vmatmul.mubr.msk.f32.gmra.mrb[64].mxu0 %vm310_vm4, %v2889_v54  ;;  %v1570_v4 = vpop.xlane.xlu0 %1569 }
0x141e   :  { %4079 = vrcp.f32 %v1570_v4 }
0x1421   :  { %v4078_v52 = vpop.eup %4077 }
0x1422   :  { %v1573_v63 = vmul.f32 %v4078_v52, %v4074_v51 }
0x1424   :  { %1575 = vst [vmem:[#allocation8] sm:$0xff] %v1573_v63 }
0x1428   :  { %v4080_v62 = vpop.eup %4079 }
0x1429   :  { %v1574_v44 = vmul.f32 %v4080_v62, %v4076_v45 }
0x142b   :  { %1576 = vst [vmem:[#allocation8 + $0x8] sm:$0xff] %v1574_v44 }
0x14e3   :  { %v3761_v40 = vpop.f32.mrb[60].mxu0 }
0x14e4   :  { %v2989_v2 = vadd.f32 %v3761_v40, %v3300_v31  ;;  %v2983_v34 = vpop.f32.mrb[61].mxu0 }
0x14e5   :  { %v2984_v43 = vadd.f32 %v3300_v31, %v2983_v34 }
0x14e6   :  { %v3013_v0 = vmax.f32 %v2989_v2, 0.0 }
0x14e7   :  { %v3012_v8 = vmax.f32 %v2984_v43, 0.0 }
0x14e9   :  { %3772 = vmatprep.mubr.msk.f32.mxu1 %vm540_vm5, %v3012_v8 }
0x14ea   :  { %3773 = vmatmul.mubr.msk.f32.vlgmr.msra.gmra.mrb[64].mxu1 %vm540_vm5, %v3013_v0 }
0x14ec   :  { %v3764_v57 = vpop.f32.mrb[62].mxu0 }
0x14ed   :  { %v2999_v9 = vadd.f32 %v3764_v57, %v3300_v31  ;;  %v2993_v13 = vpop.f32.mrb[63].mxu0 }
0x14ee   :  { %v2994_v25 = vadd.f32 %v3300_v31, %v2993_v13 }
0x14ef   :  { %v3015_v17 = vmax.f32 %v2999_v9, 0.0 }
0x14f0   :  { %v3014_v7 = vmax.f32 %v2994_v25, 0.0  ;;  %v3767_v15 = vpop.f32.mrb[64].mxu0 }
0x14f1   :  { %v3009_v55 = vadd.f32 %v3767_v15, %v3300_v31  ;;  %v3003_v41 = vpop.f32.mrb[65].mxu0 }
0x14f2   :  { %v3004_v59 = vadd.f32 %v3300_v31, %v3003_v41  ;;  %3775 = vmatprep.mubr.msk.f32.mxu1 %vm540_vm5, %v3014_v7 }
0x14f3   :  { %3776 = vmatmul.mubr.msk.f32.gmra.mrb[66].mxu1 %vm540_vm5, %v3015_v17  ;;  %v3017_v48 = vmax.f32 %v3009_v55, 0.0 }
0x14f4   :  { %v3016_v32 = vmax.f32 %v3004_v59, 0.0 }
0x14f6   :  { %3778 = vmatprep.mubr.msk.f32.mxu1 %vm540_vm5, %v3016_v32 }
0x14f7   :  { %3779 = vmatmul.mubr.msk.f32.gmra.mrb[68].mxu1 %vm540_vm5, %v3017_v48 }
0x14f8   :  { %4143 = shalt.err (!%p4140_p6)
}
0x14f9   :  { %s4144_s17 = scalar_lea.hbm %s5042_s8, 256 }
0x14fa   :  { %p4145_p7 = scmp.ne.s32.totalorder %s5042_s8, %s4144_s17  ;;  %p4148_p8 = scmp.lt.u32.totalorder %s4144_s17, %s5042_s8 }
0x14fc   :  { %p4150_p9 = pnand %p4148_p8, %p4145_p7 }
0x14fe   :  { %4153 = shalt.err (!%p4150_p9)
}
0x14ff   :  { %3167 = dma.vmem_to_hbm [thread:$0]  %s3162_s12, 256, %s5042_s8, [#allocation9], %s4185_s15, %s4185_s15, %s4186_s16   ;;  %v3307_v10 = vld [vmem:[#allocation5 + $0xc8] ss:$0 sm:$0xff] }
0x1500   :  { %s4194_s1 = smov [#allocation7]  }
0x1501   :  { %s3149_s24 = sshll.u32 %s4194_s1, 4  ;;  %s3150_s24 = int_to_ptr.vmem [resolvable:$true] %s3149_s24 }
0x1502   :  { %s4154_s8 = scalar_lea.vmem %s3150_s24, 768  ;;  %p4159_p11 = scmp.lt.s32.totalorder %s3150_s24, %s3150_s24 }
0x1503   :  { %p4155_p10 = scmp.ne.s32.totalorder %s3150_s24, %s4154_s8  ;;  %p4160_p12 = scmp.lt.s32.totalorder %s4154_s8, %s4154_s8 }
0x1505   :  { %p4161_p13 = por %p4160_p12, %p4159_p11 }
0x1507   :  { %p4162_p0 = pnand %p4161_p13, %p4155_p10 }
0x15bd   :  { %v3774_v14 = vpop.f32.mrb[64].mxu1 }
0x15be   :  { %v3115_v33 = vadd.f32 %v3774_v14, %v3307_v10  ;;  %v3109_v24 = vpop.f32.mrb[65].mxu1 }
0x15bf   :  { %v3110_v12 = vadd.f32 %v3307_v10, %v3109_v24 }
0x15c0   :  { %3139 = vst [vmem:[#allocation7 + $0x8] sm:$0xff] %v3115_v33 }
0x15c1   :  { %3138 = vst [vmem:[#allocation7] sm:$0xff] %v3110_v12 }
0x15c6   :  { %v3777_v49 = vpop.f32.mrb[66].mxu1 }
0x15c7   :  { %v3125_v42 = vadd.f32 %v3777_v49, %v3307_v10  ;;  %v3119_v53 = vpop.f32.mrb[67].mxu1 }
0x15c8   :  { %v3120_v21 = vadd.f32 %v3307_v10, %v3119_v53 }
0x15c9   :  { %3141 = vst [vmem:[#allocation7 + $0x18] sm:$0xff] %v3125_v42 }
0x15ca   :  { %3140 = vst [vmem:[#allocation7 + $0x10] sm:$0xff] %v3120_v21  ;;  %v3780_v6 = vpop.f32.mrb[68].mxu1 }
0x15cb   :  { %v3135_v28 = vadd.f32 %v3780_v6, %v3307_v10  ;;  %v3129_v35 = vpop.f32.mrb[69].mxu1 }
0x15cc   :  { %v3130_v51 = vadd.f32 %v3307_v10, %v3129_v35 }
0x15cd   :  { %3143 = vst [vmem:[#allocation7 + $0x28] sm:$0xff] %v3135_v28 }
0x15ce   :  { %3142 = vst [vmem:[#allocation7 + $0x20] sm:$0xff] %v3130_v51 }
0x15cf   :  { %4165 = shalt.err (!%p4162_p0)
}
0x15d0   :  { %s4166_s27 = scalar_lea.hbm %s5041_s7, 768 }
0x15d1   :  { %p4167_p1 = scmp.ne.s32.totalorder %s5041_s7, %s4166_s27  ;;  %p4170_p2 = scmp.lt.u32.totalorder %s4166_s27, %s5041_s7 }
0x15d3   :  { %p4172_p3 = pnand %p4170_p2, %p4167_p1 }
0x15d5   :  { %4175 = shalt.err (!%p4172_p3)
}
0x15d6   :  { %3155 = dma.vmem_to_hbm [thread:$0]  %s3150_s24, 768, %s5041_s7, [#allocation4], %s4185_s15, %s4185_s15, %s4186_s16  }
0x15d7   :  { %4180 = dma.done.wait [#allocation4], 768  }
0x15d8   :  { %4181 = vsyncadd [#allocation4], 4294966528 }
0x15d9   :  { %4182 = dma.done.wait [#allocation9], 256  }
0x15da   :  { %4183 = vsyncadd [#allocation9], 4294967040 }
0x15db   :  { %3174 = vsyncpa [#allocation3], 1 }
0x15dc   :  { %3175 = vsyncpa [#allocation6], 1 }
0x15dd   :  { %3176 = vsyncpa [#allocation4], 1 }
0x15de   :  { %3177 = vsyncpa [#allocation9], 1 }

</bundles_post_ra>
